<compile_context>
chip_gen: v5e
topology: v5e:2x2
jax: 0.10.0
libtpu: 0.0.40
codegen_flags: <defaults>
</compile_context>

<pallas_src>
import functools

import numpy as np
import jax
import jax.numpy as jnp
from jax import lax
from jax.experimental import pallas as pl
from jax.experimental.pallas import tpu as pltpu


# ----------------------------------------------------------------------------- fused kernel
def _codec_kernel(x_ref, wfront_ref, w1_ref, w2_ref, bnb_ref, wout_ref, bias_ref,
                  o_ref, *, img_w, pt_from_dot):
    """One (batch, row-tile) step.  x_ref holds the tile WITH a P-row halo top+bottom."""
    nm = bnb_ref.shape[-1]            # n_blocks * mid_channels
    K = w1_ref.shape[0]               # max kernel size (odd); taps centered
    P = K // 2
    l_out, out_pad = o_ref.shape      # output positions (no halo), lane-padded channels
    mm_dtype = wfront_ref.dtype       # matmul-input dtype (bf16/f32); accumulation is f32

    xt = x_ref[...]                                                     # (L_h, C_in)

    # fused 1x1 convs: [passthrough (lane-aligned, if any) | all sub-block input_compress]
    cc = jnp.dot(xt.astype(mm_dtype), wfront_ref[...],
                 preferred_element_type=jnp.float32)
    if pt_from_dot:
        m0 = cc[:, out_pad:].astype(mm_dtype)                           # (L_h, nm)
        pt = cc[P * img_w:P * img_w + l_out, :out_pad]                  # (l_out, out_pad)
    else:
        # identity passthrough (in_ch == out_ch): skip its MXU columns, add x directly
        m0 = cc.astype(mm_dtype)
        pt = xt[P * img_w:P * img_w + l_out, :].astype(jnp.float32)
        if pt.shape[1] < out_pad:
            pt = jnp.concatenate(
                [pt, jnp.zeros((l_out, out_pad - pt.shape[1]), jnp.float32)], axis=1)

    # separable conv #1: (1, k) along W — K per-tap dots, no (L, K*nm) intermediate.
    # Zero padding along W is an in-kernel iota mask (no precomputed mask DMA); the roll's
    # array-boundary wrap always lands on masked-out columns, so no extra fixup is needed.
    col = lax.broadcasted_iota(jnp.int32, (m0.shape[0], 1), 0) % img_w
    y1 = jnp.zeros((m0.shape[0], nm), jnp.float32)
    for t in range(K):
        d = t - P
        if d == 0:
            tap_in = m0
        else:
            valid = (col + d >= 0) & (col + d < img_w)
            # TODO(synk): pltpu.roll would run this shift on the XLU; jnp.roll (concat of two
            # slices) is used for interpret-mode portability.
            tap_in = jnp.where(valid, jnp.roll(m0, -d, axis=0), 0.0)
        y1 = y1 + jnp.dot(tap_in, w1_ref[t], preferred_element_type=jnp.float32)

    # separable conv #2: (k, 1) along H (BN scale folded in).  The P-row halo turns every tap
    # into a static row slice; zero halo rows at the image border supply the zero padding.
    y1 = y1.astype(mm_dtype)
    y2 = jnp.zeros((l_out, nm), jnp.float32)
    for t in range(K):
        y2 = y2 + jnp.dot(y1[t * img_w:t * img_w + l_out, :], w2_ref[t],
                          preferred_element_type=jnp.float32)

    # folded BN bias + Mish in single-exp form:
    #   mish(z) = z * tanh(softplus(z)) = z * u / (u + 2),  u = e*(e+2),  e = exp(z)
    z = y2 + bnb_ref[...]
    e = jnp.exp(jnp.minimum(z, 20.0))          # clamp matches torch softplus threshold=20
    u = e * (e + 2.0)
    act = z * u / (u + 2.0)
    # TODO(synk): pl.reciprocal(u + 2.0, approx=True) would cut the divide's VPU cost; kept as a
    # plain divide for interpret-mode portability.

    # fused output 1x1 convs (block-diagonal, lane-padded) + folded biases + passthrough
    out = (jnp.dot(act.astype(mm_dtype), wout_ref[...],
                   preferred_element_type=jnp.float32)
           + bias_ref[...] + pt)
    o_ref[...] = out.astype(o_ref.dtype)


# ----------------------------------------------------------------------------- parameter folding
def _fold_params(params, in_ch, eps, lane_multiple=128):
    """Fold all module parameters into the fused kernel operands (pure JAX, trace-time)."""
    blocks = params['blocks']
    n = len(blocks)
    M = int(blocks[0]['conv1_weight'].shape[0])
    nM = n * M
    ksizes = [int(b['kernel_size']) for b in blocks]
    for k in ksizes:
        assert k % 2 == 1, "odd kernel sizes required (padding k//2 preserves spatial size)"
    K = max(ksizes)
    P = K // 2

    o_sizes = [int(b['out_weight'].shape[0]) for b in blocks]
    out_ch = int(sum(o_sizes))
    offs = np.cumsum([0] + o_sizes)
    # lane-dense output stores: pad channels to a multiple of 128 (extra MXU columns are in
    # already-padded lanes; the wrapper slices the padding off).  Costs extra writeback bytes
    # when out_ch << 128 — out_dtype=bf16 halves that if it matters.
    out_pad = (-(-out_ch // lane_multiple)) * lane_multiple

    f32 = jnp.float32
    pt_from_dot = params['passthrough'] is not None
    pt_cols = out_pad if pt_from_dot else 0          # identity passthrough: no MXU columns
    w_front = jnp.zeros((in_ch, pt_cols + nM), f32)
    w1 = jnp.zeros((K, nM, nM), f32)                 # per-tap block-diagonal (1,k) weights
    w2 = jnp.zeros((K, nM, nM), f32)                 # per-tap block-diagonal (k,1) weights
    bn_bias = jnp.zeros((nM,), f32)
    w_out = jnp.zeros((nM, out_pad), f32)
    bias_all = jnp.zeros((out_pad,), f32)

    for i, b in enumerate(blocks):
        k = int(b['kernel_size'])
        p = k // 2
        cw = b['compress_weight']
        # TODO(synk): when compress is Identity (in_ch == mid) these columns are an eye() and
        # could be skipped like the identity passthrough.
        cmat = jnp.eye(in_ch, M, dtype=f32) if cw is None else jnp.reshape(cw, (M, in_ch)).T
        w_front = w_front.at[:, pt_cols + i * M: pt_cols + (i + 1) * M].set(cmat)

        # BatchNorm (eval) folded: scale into conv2 output columns, bias kept separately
        s = b['bn_gamma'] / jnp.sqrt(b['bn_var'] + eps)
        bn_bias = bn_bias.at[i * M:(i + 1) * M].set(b['bn_beta'] - b['bn_mean'] * s)

        for j in range(k):
            t = j + (P - p)                      # center smaller kernels in the K-tap grid
            w1_j = b['conv1_weight'][:, :, 0, j].T                     # (M_in, M_out)
            w2_j = b['conv2_weight'][:, :, j, 0].T * s[None, :]        # BN scale folded
            w1 = w1.at[t, i * M:(i + 1) * M, i * M:(i + 1) * M].set(w1_j)
            w2 = w2.at[t, i * M:(i + 1) * M, i * M:(i + 1) * M].set(w2_j)

        # output_compress (1x1, with bias) -> block-diagonal output matrix
        ow = jnp.reshape(b['out_weight'], (o_sizes[i], M))
        w_out = w_out.at[i * M:(i + 1) * M, offs[i]:offs[i + 1]].set(ow.T)
        bias_all = bias_all.at[offs[i]:offs[i + 1]].set(b['out_bias'])

    if pt_from_dot:
        pw = jnp.reshape(params['passthrough']['weight'], (out_ch, in_ch))
        w_front = w_front.at[:, :out_ch].set(pw.T)
        bias_all = bias_all.at[:out_ch].add(params['passthrough']['bias'])

    # TODO(synk): when nM >= 256 the per-tap block-diagonal dots should be split per sub-block
    # to avoid issuing n x the necessary MXU FLOPs.
    return (w_front, w1, w2, bn_bias.reshape(1, nM), w_out,
            bias_all.reshape(1, out_pad), out_ch, out_pad, K, pt_from_dot)


# ----------------------------------------------------------------------------- wrapper
def codec_multi_kernel_block(x, params, *, eps=1e-5, row_tile=None,
                             matmul_dtype=jnp.bfloat16, out_dtype=jnp.float32):
    """x: (B, C_in, H, W) float32 (NCHW, torch layout).  Returns (B, out_channels, H, W)."""
    B, C_in, H, W = x.shape
    (w_front, w1, w2, bn_bias, w_out, bias_all, out_ch, out_pad, K, pt_from_dot) = \
        _fold_params(params, C_in, eps)
    nM = bn_bias.shape[-1]
    P = K // 2

    w_front = w_front.astype(matmul_dtype)
    w1 = w1.astype(matmul_dtype)
    w2 = w2.astype(matmul_dtype)
    w_out = w_out.astype(matmul_dtype)
    front_cols = w_front.shape[1]

    # ---- spatial (H) tiling: bound per-step VMEM, give the pipeline many steps -------------
    if row_tile is None:
        per_row = 4 * W * (C_in + front_cols + 3 * nM + 2 * out_pad)   # ~f32 live bytes / row
        row_tile = int(max(1, (8 * 1024 * 1024) // max(per_row, 1)))
    TR = int(min(row_tile, H))          # output rows per grid step
    n_tiles = -(-H // TR)
    H_pad = n_tiles * TR                # H rounded up to the tile size (zero rows, sliced off)
    R_h = TR + 2 * P                    # input rows per step (with halo)
    L_h = R_h * W
    L_out = TR * W

    # NCHW -> NHWC; pad H by the conv zero padding (P) plus the tile remainder; build
    # overlapping row tiles (halo recompute) — outputs stay non-overlapping.
    xh = jnp.transpose(x, (0, 2, 3, 1))                                 # (B, H, W, C_in)
    xh = jnp.pad(xh, ((0, 0), (P, H_pad - H + P), (0, 0), (0, 0)))
    rows = np.arange(n_tiles)[:, None] * TR + np.arange(R_h)[None, :]   # (n_tiles, R_h)
    x_tiles = xh[:, rows].reshape(B, n_tiles, L_h, C_in)

    # VMEM budget: double-buffered x/out tiles + resident weights + in-flight activations.
    itemsize = jnp.dtype(matmul_dtype).itemsize
    weight_bytes = (w_front.size + w1.size + w2.size + w_out.size) * itemsize \
        + (bn_bias.size + bias_all.size) * 4
    act_bytes = 4 * (L_h * (C_in + front_cols + 2 * nM) + L_out * (2 * nM + 2 * out_pad))
    vmem_limit = int(min(64 * 1024 * 1024,
                         max(32 * 1024 * 1024, 2 * weight_bytes + 2 * act_bytes)))

    def _const_spec(arr):
        """Resident (grid-invariant) operand: single-buffer it when the jax version allows."""
        ndim = arr.ndim
        try:
            return pl.BlockSpec(arr.shape, lambda b, t: (0,) * ndim,
                                pipeline_mode=pl.Buffered(1))
        except (AttributeError, TypeError):
            return pl.BlockSpec(arr.shape, lambda b, t: (0,) * ndim)

    kernel = functools.partial(_codec_kernel, img_w=W, pt_from_dot=pt_from_dot)
    out_tiles = pl.pallas_call(
        kernel,
        out_shape=jax.ShapeDtypeStruct((B, n_tiles, L_out, out_pad), out_dtype),
        grid_spec=pltpu.PrefetchScalarGridSpec(
            num_scalar_prefetch=0,
            grid=(B, n_tiles),                          # both axes independent -> "parallel"
            in_specs=[
                pl.BlockSpec((None, None, L_h, C_in), lambda b, t: (b, t, 0, 0)),  # x tile+halo
                _const_spec(w_front),    # [passthrough | compress] 1x1 weights (resident)
                _const_spec(w1),         # (K, nM, nM) per-tap (1,k) weights
                _const_spec(w2),         # (K, nM, nM) per-tap (k,1) weights, BN-scaled
                _const_spec(bn_bias),    # folded BN bias
                _const_spec(w_out),      # block-diag output 1x1 (lane-padded)
                _const_spec(bias_all),   # folded output + passthrough bias (lane-padded)
            ],
            out_specs=pl.BlockSpec((None, None, L_out, out_pad), lambda b, t: (b, t, 0, 0)),
        ),
        compiler_params=pltpu.CompilerParams(
            dimension_semantics=("parallel", "parallel"),
            vmem_limit_bytes=vmem_limit),
    )(x_tiles, w_front, w1, w2, bn_bias, w_out, bias_all)

    out = out_tiles.reshape(B, H_pad, W, out_pad)[:, :H, :, :out_ch]
    return jnp.transpose(out, (0, 3, 1, 2))


# ----------------------------------------------------------------------------- reference & test
def _reference(x, params, eps=1e-5):
    """Pure-JAX reference of the PyTorch forward (eval-mode BN)."""
    def conv(inp, w, pad_h, pad_w):
        return lax.conv_general_dilated(
            inp, w, window_strides=(1, 1),
            padding=((pad_h, pad_h), (pad_w, pad_w)),
            dimension_numbers=('NCHW', 'OIHW', 'NCHW'),
            precision=lax.Precision.HIGHEST)

    outs = []
    for blk in params['blocks']:
        y = x
        if blk['compress_weight'] is not None:
            y = conv(y, blk['compress_weight'][:, :, None, None], 0, 0)
        k = int(blk['kernel_size'])
        p = k // 2
        y = conv(y, blk['conv1_weight'], 0, p)
        y = conv(y, blk['conv2_weight'], p, 0)
        s = blk['bn_gamma'] / jnp.sqrt(blk['bn_var'] + eps)
        y = (y - blk['bn_mean'][None, :, None, None]) * s[None, :, None, None] \
            + blk['bn_beta'][None, :, None, None]
        y = y * jnp.tanh(jax.nn.softplus(y))                      # Mish
        y = conv(y, blk['out_weight'][:, :, None, None], 0, 0) \
            + blk['out_bias'][None, :, None, None]
        outs.append(y)
    cat = jnp.concatenate(outs, axis=1)
    if params['passthrough'] is None:
        pt = x
    else:
        pt = conv(x, params['passthrough']['weight'][:, :, None, None], 0, 0) \
            + params['passthrough']['bias'][None, :, None, None]
    return cat + pt


def init_params(key, in_channels, middle_ch, out_channels, kernels):
    n = len(kernels)
    splits = [int(round(i * out_channels / n)) for i in range(n + 1)]   # torch's channel split
    keys = iter(jax.random.split(key, 16 * n + 4))   # generous pool (fixes prior StopIteration)
    blocks = []
    for i, k in enumerate(kernels):
        o_i = splits[i + 1] - splits[i]
        blocks.append({
            'kernel_size': k,
            'compress_weight': (None if in_channels == middle_ch else
                                jax.random.normal(next(keys), (middle_ch, in_channels),
                                                  jnp.float32) / np.sqrt(in_channels)),
            'conv1_weight': jax.random.normal(next(keys), (middle_ch, middle_ch, 1, k),
                                              jnp.float32) / np.sqrt(middle_ch * k),
            'conv2_weight': jax.random.normal(next(keys), (middle_ch, middle_ch, k, 1),
                                              jnp.float32) / np.sqrt(middle_ch * k),
            'bn_gamma': 1.0 + 0.1 * jax.random.normal(next(keys), (middle_ch,), jnp.float32),
            'bn_beta': 0.1 * jax.random.normal(next(keys), (middle_ch,), jnp.float32),
            'bn_mean': 0.1 * jax.random.normal(next(keys), (middle_ch,), jnp.float32),
            'bn_var': jnp.abs(1.0 + 0.1 * jax.random.normal(next(keys), (middle_ch,),
                                                            jnp.float32)),
            'out_weight': jax.random.normal(next(keys), (o_i, middle_ch),
                                            jnp.float32) / np.sqrt(middle_ch),
            'out_bias': 0.1 * jax.random.normal(next(keys), (o_i,), jnp.float32),
        })
    if in_channels == out_channels:
        passthrough = None
    else:
        passthrough = {
            'weight': jax.random.normal(next(keys), (out_channels, in_channels),
                                        jnp.float32) / np.sqrt(in_channels),
            'bias': 0.1 * jax.random.normal(next(keys), (out_channels,), jnp.float32),
        }
    return {'blocks': blocks, 'passthrough': passthrough}


if __name__ == "__main__":
    B, C_in, H, W = 2, 4, 16, 16
    middle_ch, out_channels, kernels = 8, 6, [3, 5]

    key = jax.random.PRNGKey(0)
    params = init_params(key, C_in, middle_ch, out_channels, kernels)
    x = jax.random.normal(jax.random.fold_in(key, 123), (B, C_in, H, W), dtype=jnp.float32)

    ref = _reference(x, params)

    # f32 matmul path, row_tile=6 -> 3 spatial tiles per image: exercises the halo,
    # non-dividing-H padding and multi-step pipeline.  Tight correctness check.
    out_f32 = jax.block_until_ready(
        codec_multi_kernel_block(x, params, row_tile=6, matmul_dtype=jnp.float32))
    assert out_f32.shape == (B, out_channels, H, W) and out_f32.shape == ref.shape
    np.testing.assert_allclose(np.asarray(out_f32), np.asarray(ref), rtol=1e-2, atol=1e-2)

    # default bf16 matmul path (f32 accumulation): loose sanity bound — bf16 casts through
    # three chained matmuls accumulate ~1e-2-level error; the f32 run above is the real check.
    out_bf16 = jax.block_until_ready(
        codec_multi_kernel_block(x, params, row_tile=8))
    assert out_bf16.shape == ref.shape
    np.testing.assert_allclose(np.asarray(out_bf16), np.asarray(ref), rtol=1e-1, atol=1e-1)

    print("KERNEL_OK")
</pallas_src>

<mosaic_0001>
module attributes {stable_mosaic.version = 11 : i64} {
  func.func @_codec_kernel(%arg0: i32, %arg1: i32, %arg2: memref<1x1x160x4xf32, #tpu.memory_space<vmem>>, %arg3: memref<4x144xf32, #tpu.memory_space<vmem>>, %arg4: memref<5x16x16xf32, #tpu.memory_space<vmem>>, %arg5: memref<5x16x16xf32, #tpu.memory_space<vmem>>, %arg6: memref<1x16xf32, #tpu.memory_space<vmem>>, %arg7: memref<16x128xf32, #tpu.memory_space<vmem>>, %arg8: memref<1x128xf32, #tpu.memory_space<vmem>>, %arg9: memref<1x1x96x128xf32, #tpu.memory_space<vmem>>) attributes {dimension_semantics = [#tpu.dimension_semantics<parallel>, #tpu.dimension_semantics<parallel>], iteration_bounds = array<i64: 2, 3>, scalar_prefetch = 0 : i64, scratch_operands = 0 : i64, tpu.core_type = #tpu.core_type<tc>, window_params = [{transform_indices = @transform_0, window_bounds = array<i64: 1, 1, 160, 4>}, {pipeline_mode = #tpu.pipeline_mode<synchronous>, transform_indices = @transform_1, window_bounds = array<i64: 4, 144>}, {pipeline_mode = #tpu.pipeline_mode<synchronous>, transform_indices = @transform_2, window_bounds = array<i64: 5, 16, 16>}, {pipeline_mode = #tpu.pipeline_mode<synchronous>, transform_indices = @transform_3, window_bounds = array<i64: 5, 16, 16>}, {pipeline_mode = #tpu.pipeline_mode<synchronous>, transform_indices = @transform_4, window_bounds = array<i64: 1, 16>}, {pipeline_mode = #tpu.pipeline_mode<synchronous>, transform_indices = @transform_5, window_bounds = array<i64: 16, 128>}, {pipeline_mode = #tpu.pipeline_mode<synchronous>, transform_indices = @transform_6, window_bounds = array<i64: 1, 128>}, {transform_indices = @transform_7, window_bounds = array<i64: 1, 1, 96, 128>}]} {
    %c0 = arith.constant 0 : index
    %c0_0 = arith.constant 0 : index
    %c0_1 = arith.constant 0 : index
    %c0_2 = arith.constant 0 : index
    %0 = vector.load %arg2[%c0, %c0_0, %c0_1, %c0_2] : memref<1x1x160x4xf32, #tpu.memory_space<vmem>>, vector<1x1x160x4xf32>
    %1 = vector.shape_cast %0 : vector<1x1x160x4xf32> to vector<160x4xf32>
    %c0_3 = arith.constant 0 : index
    %c0_4 = arith.constant 0 : index
    %2 = vector.load %arg3[%c0_3, %c0_4] : memref<4x144xf32, #tpu.memory_space<vmem>>, vector<4x144xf32>
    %cst = arith.constant dense<0.000000e+00> : vector<160x144xf32>
    %3 = tpu.matmul %1, %2, %cst {dimension_numbers = #tpu.dot_dimension_numbers<[1], [0], [0], [1], [0, 0, 1, 1], [], []>} : vector<160x4xf32>, vector<4x144xf32>, vector<160x144xf32> -> vector<160x144xf32>
    %4 = vector.extract_strided_slice %3 {offsets = [0, 128], sizes = [160, 16], strides = [1, 1]} : vector<160x144xf32> to vector<160x16xf32>
    %5 = vector.extract_strided_slice %3 {offsets = [32, 0], sizes = [96, 128], strides = [1, 1]} : vector<160x144xf32> to vector<96x128xf32>
    %6 = tpu.iota {dimensions = array<i32: 0>} : vector<160x1xi32>
    %c16_i32 = arith.constant 16 : i32
    %c0_i32 = arith.constant 0 : i32
    %7 = arith.cmpi eq, %c16_i32, %c0_i32 : i32
    %c1_i32 = arith.constant 1 : i32
    %8 = arith.select %7, %c1_i32, %c16_i32 : i32
    %9 = vector.broadcast %8 : i32 to vector<160x1xi32>
    %10 = arith.remsi %6, %9 : vector<160x1xi32>
    %c0_i32_5 = arith.constant 0 : i32
    %11 = vector.broadcast %c0_i32_5 : i32 to vector<160x1xi32>
    %12 = arith.cmpi ne, %10, %11 : vector<160x1xi32>
    %c0_i32_6 = arith.constant 0 : i32
    %13 = vector.broadcast %c0_i32_6 : i32 to vector<160x1xi32>
    %14 = arith.cmpi slt, %10, %13 : vector<160x1xi32>
    %c0_i32_7 = arith.constant 0 : i32
    %15 = arith.cmpi slt, %8, %c0_i32_7 : i32
    %16 = vector.broadcast %15 : i1 to vector<160x1xi1>
    %17 = vector.broadcast %16 : vector<160x1xi1> to vector<160x1xi1>
    %18 = arith.xori %14, %17 : vector<160x1xi1>
    %19 = arith.andi %18, %12 : vector<160x1xi1>
    %20 = vector.broadcast %8 : i32 to vector<160x1xi32>
    %21 = arith.addi %10, %20 : vector<160x1xi32>
    %22 = arith.select %19, %21, %10 : vector<160x1xi1>, vector<160x1xi32>
    %cst_8 = arith.constant 0.000000e+00 : f32
    %23 = vector.broadcast %cst_8 : f32 to vector<160x16xf32>
    %c-2_i32 = arith.constant -2 : i32
    %24 = vector.broadcast %c-2_i32 : i32 to vector<160x1xi32>
    %25 = arith.addi %22, %24 : vector<160x1xi32>
    %c0_i32_9 = arith.constant 0 : i32
    %26 = vector.broadcast %c0_i32_9 : i32 to vector<160x1xi32>
    %27 = arith.cmpi sge, %25, %26 : vector<160x1xi32>
    %c-2_i32_10 = arith.constant -2 : i32
    %28 = vector.broadcast %c-2_i32_10 : i32 to vector<160x1xi32>
    %29 = arith.addi %22, %28 : vector<160x1xi32>
    %c16_i32_11 = arith.constant 16 : i32
    %30 = vector.broadcast %c16_i32_11 : i32 to vector<160x1xi32>
    %31 = arith.cmpi slt, %29, %30 : vector<160x1xi32>
    %32 = arith.andi %27, %31 : vector<160x1xi1>
    %33 = vector.extract_strided_slice %4 {offsets = [158, 0], sizes = [2, 16], strides = [1, 1]} : vector<160x16xf32> to vector<2x16xf32>
    %34 = vector.extract_strided_slice %4 {offsets = [0, 0], sizes = [158, 16], strides = [1, 1]} : vector<160x16xf32> to vector<158x16xf32>
    %35 = tpu.concatenate %33, %34 in 0 : vector<2x16xf32>, vector<158x16xf32> -> vector<160x16xf32>
    %cst_12 = arith.constant 0.000000e+00 : f32
    %36 = vector.shape_cast %32 : vector<160x1xi1> to vector<160x1xi1>
    %37 = vector.broadcast %36 : vector<160x1xi1> to vector<160x16xi1>
    %38 = vector.broadcast %cst_12 : f32 to vector<160x16xf32>
    %39 = arith.select %37, %35, %38 : vector<160x16xi1>, vector<160x16xf32>
    %c0_13 = arith.constant 0 : index
    %c0_14 = arith.constant 0 : index
    %c0_15 = arith.constant 0 : index
    %40 = vector.load %arg4[%c0_13, %c0_14, %c0_15] : memref<5x16x16xf32, #tpu.memory_space<vmem>>, vector<1x16x16xf32>
    %41 = vector.shape_cast %40 : vector<1x16x16xf32> to vector<16x16xf32>
    %cst_16 = arith.constant dense<0.000000e+00> : vector<160x16xf32>
    %42 = tpu.matmul %39, %41, %cst_16 {dimension_numbers = #tpu.dot_dimension_numbers<[1], [0], [0], [1], [0, 0, 1, 1], [], []>} : vector<160x16xf32>, vector<16x16xf32>, vector<160x16xf32> -> vector<160x16xf32>
    %43 = arith.addf %23, %42 : vector<160x16xf32>
    %c-1_i32 = arith.constant -1 : i32
    %44 = vector.broadcast %c-1_i32 : i32 to vector<160x1xi32>
    %45 = arith.addi %22, %44 : vector<160x1xi32>
    %c0_i32_17 = arith.constant 0 : i32
    %46 = vector.broadcast %c0_i32_17 : i32 to vector<160x1xi32>
    %47 = arith.cmpi sge, %45, %46 : vector<160x1xi32>
    %c-1_i32_18 = arith.constant -1 : i32
    %48 = vector.broadcast %c-1_i32_18 : i32 to vector<160x1xi32>
    %49 = arith.addi %22, %48 : vector<160x1xi32>
    %c16_i32_19 = arith.constant 16 : i32
    %50 = vector.broadcast %c16_i32_19 : i32 to vector<160x1xi32>
    %51 = arith.cmpi slt, %49, %50 : vector<160x1xi32>
    %52 = arith.andi %47, %51 : vector<160x1xi1>
    %53 = vector.extract_strided_slice %4 {offsets = [159, 0], sizes = [1, 16], strides = [1, 1]} : vector<160x16xf32> to vector<1x16xf32>
    %54 = vector.extract_strided_slice %4 {offsets = [0, 0], sizes = [159, 16], strides = [1, 1]} : vector<160x16xf32> to vector<159x16xf32>
    %55 = tpu.concatenate %53, %54 in 0 : vector<1x16xf32>, vector<159x16xf32> -> vector<160x16xf32>
    %cst_20 = arith.constant 0.000000e+00 : f32
    %56 = vector.shape_cast %52 : vector<160x1xi1> to vector<160x1xi1>
    %57 = vector.broadcast %56 : vector<160x1xi1> to vector<160x16xi1>
    %58 = vector.broadcast %cst_20 : f32 to vector<160x16xf32>
    %59 = arith.select %57, %55, %58 : vector<160x16xi1>, vector<160x16xf32>
    %c1 = arith.constant 1 : index
    %c0_21 = arith.constant 0 : index
    %c0_22 = arith.constant 0 : index
    %60 = vector.load %arg4[%c1, %c0_21, %c0_22] : memref<5x16x16xf32, #tpu.memory_space<vmem>>, vector<1x16x16xf32>
    %61 = vector.shape_cast %60 : vector<1x16x16xf32> to vector<16x16xf32>
    %cst_23 = arith.constant dense<0.000000e+00> : vector<160x16xf32>
    %62 = tpu.matmul %59, %61, %cst_23 {dimension_numbers = #tpu.dot_dimension_numbers<[1], [0], [0], [1], [0, 0, 1, 1], [], []>} : vector<160x16xf32>, vector<16x16xf32>, vector<160x16xf32> -> vector<160x16xf32>
    %63 = arith.addf %43, %62 : vector<160x16xf32>
    %c2 = arith.constant 2 : index
    %c0_24 = arith.constant 0 : index
    %c0_25 = arith.constant 0 : index
    %64 = vector.load %arg4[%c2, %c0_24, %c0_25] : memref<5x16x16xf32, #tpu.memory_space<vmem>>, vector<1x16x16xf32>
    %65 = vector.shape_cast %64 : vector<1x16x16xf32> to vector<16x16xf32>
    %cst_26 = arith.constant dense<0.000000e+00> : vector<160x16xf32>
    %66 = tpu.matmul %4, %65, %cst_26 {dimension_numbers = #tpu.dot_dimension_numbers<[1], [0], [0], [1], [0, 0, 1, 1], [], []>} : vector<160x16xf32>, vector<16x16xf32>, vector<160x16xf32> -> vector<160x16xf32>
    %67 = arith.addf %63, %66 : vector<160x16xf32>
    %c1_i32_27 = arith.constant 1 : i32
    %68 = vector.broadcast %c1_i32_27 : i32 to vector<160x1xi32>
    %69 = arith.addi %22, %68 : vector<160x1xi32>
    %c0_i32_28 = arith.constant 0 : i32
    %70 = vector.broadcast %c0_i32_28 : i32 to vector<160x1xi32>
    %71 = arith.cmpi sge, %69, %70 : vector<160x1xi32>
    %c1_i32_29 = arith.constant 1 : i32
    %72 = vector.broadcast %c1_i32_29 : i32 to vector<160x1xi32>
    %73 = arith.addi %22, %72 : vector<160x1xi32>
    %c16_i32_30 = arith.constant 16 : i32
    %74 = vector.broadcast %c16_i32_30 : i32 to vector<160x1xi32>
    %75 = arith.cmpi slt, %73, %74 : vector<160x1xi32>
    %76 = arith.andi %71, %75 : vector<160x1xi1>
    %77 = vector.extract_strided_slice %4 {offsets = [1, 0], sizes = [159, 16], strides = [1, 1]} : vector<160x16xf32> to vector<159x16xf32>
    %78 = vector.extract_strided_slice %4 {offsets = [0, 0], sizes = [1, 16], strides = [1, 1]} : vector<160x16xf32> to vector<1x16xf32>
    %79 = tpu.concatenate %77, %78 in 0 : vector<159x16xf32>, vector<1x16xf32> -> vector<160x16xf32>
    %cst_31 = arith.constant 0.000000e+00 : f32
    %80 = vector.shape_cast %76 : vector<160x1xi1> to vector<160x1xi1>
    %81 = vector.broadcast %80 : vector<160x1xi1> to vector<160x16xi1>
    %82 = vector.broadcast %cst_31 : f32 to vector<160x16xf32>
    %83 = arith.select %81, %79, %82 : vector<160x16xi1>, vector<160x16xf32>
    %c3 = arith.constant 3 : index
    %c0_32 = arith.constant 0 : index
    %c0_33 = arith.constant 0 : index
    %84 = vector.load %arg4[%c3, %c0_32, %c0_33] : memref<5x16x16xf32, #tpu.memory_space<vmem>>, vector<1x16x16xf32>
    %85 = vector.shape_cast %84 : vector<1x16x16xf32> to vector<16x16xf32>
    %cst_34 = arith.constant dense<0.000000e+00> : vector<160x16xf32>
    %86 = tpu.matmul %83, %85, %cst_34 {dimension_numbers = #tpu.dot_dimension_numbers<[1], [0], [0], [1], [0, 0, 1, 1], [], []>} : vector<160x16xf32>, vector<16x16xf32>, vector<160x16xf32> -> vector<160x16xf32>
    %87 = arith.addf %67, %86 : vector<160x16xf32>
    %c2_i32 = arith.constant 2 : i32
    %88 = vector.broadcast %c2_i32 : i32 to vector<160x1xi32>
    %89 = arith.addi %22, %88 : vector<160x1xi32>
    %c0_i32_35 = arith.constant 0 : i32
    %90 = vector.broadcast %c0_i32_35 : i32 to vector<160x1xi32>
    %91 = arith.cmpi sge, %89, %90 : vector<160x1xi32>
    %c2_i32_36 = arith.constant 2 : i32
    %92 = vector.broadcast %c2_i32_36 : i32 to vector<160x1xi32>
    %93 = arith.addi %22, %92 : vector<160x1xi32>
    %c16_i32_37 = arith.constant 16 : i32
    %94 = vector.broadcast %c16_i32_37 : i32 to vector<160x1xi32>
    %95 = arith.cmpi slt, %93, %94 : vector<160x1xi32>
    %96 = arith.andi %91, %95 : vector<160x1xi1>
    %97 = vector.extract_strided_slice %4 {offsets = [2, 0], sizes = [158, 16], strides = [1, 1]} : vector<160x16xf32> to vector<158x16xf32>
    %98 = vector.extract_strided_slice %4 {offsets = [0, 0], sizes = [2, 16], strides = [1, 1]} : vector<160x16xf32> to vector<2x16xf32>
    %99 = tpu.concatenate %97, %98 in 0 : vector<158x16xf32>, vector<2x16xf32> -> vector<160x16xf32>
    %cst_38 = arith.constant 0.000000e+00 : f32
    %100 = vector.shape_cast %96 : vector<160x1xi1> to vector<160x1xi1>
    %101 = vector.broadcast %100 : vector<160x1xi1> to vector<160x16xi1>
    %102 = vector.broadcast %cst_38 : f32 to vector<160x16xf32>
    %103 = arith.select %101, %99, %102 : vector<160x16xi1>, vector<160x16xf32>
    %c4 = arith.constant 4 : index
    %c0_39 = arith.constant 0 : index
    %c0_40 = arith.constant 0 : index
    %104 = vector.load %arg4[%c4, %c0_39, %c0_40] : memref<5x16x16xf32, #tpu.memory_space<vmem>>, vector<1x16x16xf32>
    %105 = vector.shape_cast %104 : vector<1x16x16xf32> to vector<16x16xf32>
    %cst_41 = arith.constant dense<0.000000e+00> : vector<160x16xf32>
    %106 = tpu.matmul %103, %105, %cst_41 {dimension_numbers = #tpu.dot_dimension_numbers<[1], [0], [0], [1], [0, 0, 1, 1], [], []>} : vector<160x16xf32>, vector<16x16xf32>, vector<160x16xf32> -> vector<160x16xf32>
    %107 = arith.addf %87, %106 : vector<160x16xf32>
    %cst_42 = arith.constant 0.000000e+00 : f32
    %108 = vector.broadcast %cst_42 : f32 to vector<96x16xf32>
    %109 = vector.extract_strided_slice %107 {offsets = [0, 0], sizes = [96, 16], strides = [1, 1]} : vector<160x16xf32> to vector<96x16xf32>
    %c0_43 = arith.constant 0 : index
    %c0_44 = arith.constant 0 : index
    %c0_45 = arith.constant 0 : index
    %110 = vector.load %arg5[%c0_43, %c0_44, %c0_45] : memref<5x16x16xf32, #tpu.memory_space<vmem>>, vector<1x16x16xf32>
    %111 = vector.shape_cast %110 : vector<1x16x16xf32> to vector<16x16xf32>
    %cst_46 = arith.constant dense<0.000000e+00> : vector<96x16xf32>
    %112 = tpu.matmul %109, %111, %cst_46 {dimension_numbers = #tpu.dot_dimension_numbers<[1], [0], [0], [1], [0, 0, 1, 1], [], []>} : vector<96x16xf32>, vector<16x16xf32>, vector<96x16xf32> -> vector<96x16xf32>
    %113 = arith.addf %108, %112 : vector<96x16xf32>
    %114 = vector.extract_strided_slice %107 {offsets = [16, 0], sizes = [96, 16], strides = [1, 1]} : vector<160x16xf32> to vector<96x16xf32>
    %c1_47 = arith.constant 1 : index
    %c0_48 = arith.constant 0 : index
    %c0_49 = arith.constant 0 : index
    %115 = vector.load %arg5[%c1_47, %c0_48, %c0_49] : memref<5x16x16xf32, #tpu.memory_space<vmem>>, vector<1x16x16xf32>
    %116 = vector.shape_cast %115 : vector<1x16x16xf32> to vector<16x16xf32>
    %cst_50 = arith.constant dense<0.000000e+00> : vector<96x16xf32>
    %117 = tpu.matmul %114, %116, %cst_50 {dimension_numbers = #tpu.dot_dimension_numbers<[1], [0], [0], [1], [0, 0, 1, 1], [], []>} : vector<96x16xf32>, vector<16x16xf32>, vector<96x16xf32> -> vector<96x16xf32>
    %118 = arith.addf %113, %117 : vector<96x16xf32>
    %119 = vector.extract_strided_slice %107 {offsets = [32, 0], sizes = [96, 16], strides = [1, 1]} : vector<160x16xf32> to vector<96x16xf32>
    %c2_51 = arith.constant 2 : index
    %c0_52 = arith.constant 0 : index
    %c0_53 = arith.constant 0 : index
    %120 = vector.load %arg5[%c2_51, %c0_52, %c0_53] : memref<5x16x16xf32, #tpu.memory_space<vmem>>, vector<1x16x16xf32>
    %121 = vector.shape_cast %120 : vector<1x16x16xf32> to vector<16x16xf32>
    %cst_54 = arith.constant dense<0.000000e+00> : vector<96x16xf32>
    %122 = tpu.matmul %119, %121, %cst_54 {dimension_numbers = #tpu.dot_dimension_numbers<[1], [0], [0], [1], [0, 0, 1, 1], [], []>} : vector<96x16xf32>, vector<16x16xf32>, vector<96x16xf32> -> vector<96x16xf32>
    %123 = arith.addf %118, %122 : vector<96x16xf32>
    %124 = vector.extract_strided_slice %107 {offsets = [48, 0], sizes = [96, 16], strides = [1, 1]} : vector<160x16xf32> to vector<96x16xf32>
    %c3_55 = arith.constant 3 : index
    %c0_56 = arith.constant 0 : index
    %c0_57 = arith.constant 0 : index
    %125 = vector.load %arg5[%c3_55, %c0_56, %c0_57] : memref<5x16x16xf32, #tpu.memory_space<vmem>>, vector<1x16x16xf32>
    %126 = vector.shape_cast %125 : vector<1x16x16xf32> to vector<16x16xf32>
    %cst_58 = arith.constant dense<0.000000e+00> : vector<96x16xf32>
    %127 = tpu.matmul %124, %126, %cst_58 {dimension_numbers = #tpu.dot_dimension_numbers<[1], [0], [0], [1], [0, 0, 1, 1], [], []>} : vector<96x16xf32>, vector<16x16xf32>, vector<96x16xf32> -> vector<96x16xf32>
    %128 = arith.addf %123, %127 : vector<96x16xf32>
    %129 = vector.extract_strided_slice %107 {offsets = [64, 0], sizes = [96, 16], strides = [1, 1]} : vector<160x16xf32> to vector<96x16xf32>
    %c4_59 = arith.constant 4 : index
    %c0_60 = arith.constant 0 : index
    %c0_61 = arith.constant 0 : index
    %130 = vector.load %arg5[%c4_59, %c0_60, %c0_61] : memref<5x16x16xf32, #tpu.memory_space<vmem>>, vector<1x16x16xf32>
    %131 = vector.shape_cast %130 : vector<1x16x16xf32> to vector<16x16xf32>
    %cst_62 = arith.constant dense<0.000000e+00> : vector<96x16xf32>
    %132 = tpu.matmul %129, %131, %cst_62 {dimension_numbers = #tpu.dot_dimension_numbers<[1], [0], [0], [1], [0, 0, 1, 1], [], []>} : vector<96x16xf32>, vector<16x16xf32>, vector<96x16xf32> -> vector<96x16xf32>
    %133 = arith.addf %128, %132 : vector<96x16xf32>
    %c0_63 = arith.constant 0 : index
    %c0_64 = arith.constant 0 : index
    %134 = vector.load %arg6[%c0_63, %c0_64] : memref<1x16xf32, #tpu.memory_space<vmem>>, vector<1x16xf32>
    %135 = vector.broadcast %134 : vector<1x16xf32> to vector<96x16xf32>
    %136 = arith.addf %133, %135 : vector<96x16xf32>
    %cst_65 = arith.constant 2.000000e+01 : f32
    %137 = vector.broadcast %cst_65 : f32 to vector<96x16xf32>
    %138 = arith.minimumf %136, %137 : vector<96x16xf32>
    %139 = math.exp %138 : vector<96x16xf32>
    %cst_66 = arith.constant 2.000000e+00 : f32
    %140 = vector.broadcast %cst_66 : f32 to vector<96x16xf32>
    %141 = arith.addf %139, %140 : vector<96x16xf32>
    %142 = arith.mulf %139, %141 : vector<96x16xf32>
    %143 = arith.mulf %136, %142 : vector<96x16xf32>
    %cst_67 = arith.constant 2.000000e+00 : f32
    %144 = vector.broadcast %cst_67 : f32 to vector<96x16xf32>
    %145 = arith.addf %142, %144 : vector<96x16xf32>
    %146 = arith.divf %143, %145 : vector<96x16xf32>
    %c0_68 = arith.constant 0 : index
    %c0_69 = arith.constant 0 : index
    %147 = vector.load %arg7[%c0_68, %c0_69] : memref<16x128xf32, #tpu.memory_space<vmem>>, vector<16x128xf32>
    %cst_70 = arith.constant dense<0.000000e+00> : vector<96x128xf32>
    %148 = tpu.matmul %146, %147, %cst_70 {dimension_numbers = #tpu.dot_dimension_numbers<[1], [0], [0], [1], [0, 0, 1, 1], [], []>} : vector<96x16xf32>, vector<16x128xf32>, vector<96x128xf32> -> vector<96x128xf32>
    %c0_71 = arith.constant 0 : index
    %c0_72 = arith.constant 0 : index
    %149 = vector.load %arg8[%c0_71, %c0_72] : memref<1x128xf32, #tpu.memory_space<vmem>>, vector<1x128xf32>
    %150 = vector.broadcast %149 : vector<1x128xf32> to vector<96x128xf32>
    %151 = arith.addf %148, %150 : vector<96x128xf32>
    %152 = arith.addf %151, %5 : vector<96x128xf32>
    %c0_73 = arith.constant 0 : index
    %c0_74 = arith.constant 0 : index
    %c0_75 = arith.constant 0 : index
    %c0_76 = arith.constant 0 : index
    %153 = vector.load %arg9[%c0_73, %c0_74, %c0_75, %c0_76] : memref<1x1x96x128xf32, #tpu.memory_space<vmem>>, vector<1x1x96x128xf32>
    %154 = vector.shape_cast %153 : vector<1x1x96x128xf32> to vector<96x128xf32>
    %155 = vector.shape_cast %152 : vector<96x128xf32> to vector<1x1x96x128xf32>
    tpu.vector_store %arg9[%c0_73, %c0_74, %c0_75, %c0_76], %155 {strides = array<i32>} : memref<1x1x96x128xf32, #tpu.memory_space<vmem>>, vector<1x1x96x128xf32>,
    return
  }
  func.func @transform_0(%arg0: i32, %arg1: i32) -> (i32, i32, i32, i32) {
    %c0_i32 = arith.constant 0 : i32
    %c0_i32_0 = arith.constant 0 : i32
    %c0_i32_1 = arith.constant 0 : i32
    return %arg0, %arg1, %c0_i32, %c0_i32_0 : i32, i32, i32, i32
  }
  func.func @transform_1(%arg0: i32, %arg1: i32) -> (i32, i32) {
    %c0_i32 = arith.constant 0 : i32
    %c0_i32_0 = arith.constant 0 : i32
    %c0_i32_1 = arith.constant 0 : i32
    return %c0_i32, %c0_i32_0 : i32, i32
  }
  func.func @transform_2(%arg0: i32, %arg1: i32) -> (i32, i32, i32) {
    %c0_i32 = arith.constant 0 : i32
    %c0_i32_0 = arith.constant 0 : i32
    %c0_i32_1 = arith.constant 0 : i32
    %c0_i32_2 = arith.constant 0 : i32
    return %c0_i32, %c0_i32_0, %c0_i32_1 : i32, i32, i32
  }
  func.func @transform_3(%arg0: i32, %arg1: i32) -> (i32, i32, i32) {
    %c0_i32 = arith.constant 0 : i32
    %c0_i32_0 = arith.constant 0 : i32
    %c0_i32_1 = arith.constant 0 : i32
    %c0_i32_2 = arith.constant 0 : i32
    return %c0_i32, %c0_i32_0, %c0_i32_1 : i32, i32, i32
  }
  func.func @transform_4(%arg0: i32, %arg1: i32) -> (i32, i32) {
    %c0_i32 = arith.constant 0 : i32
    %c0_i32_0 = arith.constant 0 : i32
    %c0_i32_1 = arith.constant 0 : i32
    return %c0_i32, %c0_i32_0 : i32, i32
  }
  func.func @transform_5(%arg0: i32, %arg1: i32) -> (i32, i32) {
    %c0_i32 = arith.constant 0 : i32
    %c0_i32_0 = arith.constant 0 : i32
    %c0_i32_1 = arith.constant 0 : i32
    return %c0_i32, %c0_i32_0 : i32, i32
  }
  func.func @transform_6(%arg0: i32, %arg1: i32) -> (i32, i32) {
    %c0_i32 = arith.constant 0 : i32
    %c0_i32_0 = arith.constant 0 : i32
    %c0_i32_1 = arith.constant 0 : i32
    return %c0_i32, %c0_i32_0 : i32, i32
  }
  func.func @transform_7(%arg0: i32, %arg1: i32) -> (i32, i32, i32, i32) {
    %c0_i32 = arith.constant 0 : i32
    %c0_i32_0 = arith.constant 0 : i32
    %c0_i32_1 = arith.constant 0 : i32
    return %arg0, %arg1, %c0_i32, %c0_i32_0 : i32, i32, i32, i32
  }
}

</mosaic_0001>

<bundles_post_ra>
// kernel: tpu_custom_call.1
= control target key start
LH: loop header
LB: loop body
LE: loop exit
PB: predicated region body
PF: predicated region fallthrough
CT: control target
= control target key end

     0   :  { %12 = vsyncpa [#allocation3], 0  ;;  %s4936_s0 = inlined_call_operand.vmem [shape: f32[2,3,160,4], index: 0, kind: input, shape index: {}]   ;;  %s4937_s1 = inlined_call_operand.vmem [shape: f32[4,144], index: 1, kind: input, shape index: {}]   ;;  %s4938_s2 = inlined_call_operand.vmem [shape: f32[5,16,16], index: 2, kind: input, shape index: {}]   ;;  %s4939_s3 = inlined_call_operand.vmem [shape: f32[5,16,16], index: 3, kind: input, shape index: {}]   ;;  %s4940_s4 = inlined_call_operand.vmem [shape: f32[1,16], index: 4, kind: input, shape index: {}]   ;;  %s4941_s5 = inlined_call_operand.vmem [shape: f32[16,128], index: 5, kind: input, shape index: {}]   ;;  %s4942_s6 = inlined_call_operand.vmem [shape: f32[1,128], index: 6, kind: input, shape index: {}]   ;;  %s4943_s7 = inlined_call_operand.hbm [shape: f32[2,3,96,128], index: 7, kind: output, shape index: {}]  }
   0x1   :  { %14 = vsyncpa [#allocation3 + $0x1], 0  ;;  %s3757_s24 = smov 0   ;;  %s3759_s25 = smov 0  }
   0x2   :  { %s3761_s26 = smov 0   ;;  %s3763_s27 = smov 0  }
   0x3   :  { %s3765_s28 = smov 0   ;;  %s3767_s29 = smov 0  }
   0x4   :  { %s3769_s30 = smov 0   ;;  %s3771_s8 = smov 0  }
   0x5 LB: > { %s3248_s9 = sadd.s32 4294967295, %s3713_s8   ;;  %s3249_s10 = sadd.s32 4294967294, %s3713_s8   ;;  %s3713_s8 = sphi %s3771_s8, %s20_s8   ;;  %s3709_s30 = sphi %s3769_s30, %s4986_s30   ;;  %s3705_s29 = sphi %s3767_s29, %s4985_s29   ;;  %s3701_s28 = sphi %s3765_s28, %s4984_s28   ;;  %s3697_s27 = sphi %s3763_s27, %s4983_s27   ;;  %s3693_s26 = sphi %s3761_s26, %s4982_s26   ;;  %s3689_s25 = sphi %s3759_s25, %s4981_s25   ;;  %s3685_s24 = sphi %s3757_s24, %s4980_s24  }
   0x6   : > { %s29_s11 = sadd.s32 1, %s3705_s29  ;;  %s32_s12 = sadd.s32 1, %s3709_s30 }
   0x7   : > { %p30_p0 = scmp.ge.s32.totalorder %s29_s11, 3  ;;  %p205_p1 = scmp.ne.s32.totalorder %s3693_s26, %s3689_s25 }
   0x8   : > { %p206_p2 = scmp.eq.s32.totalorder %s3248_s9, 5  ;;  %p211_p5 = scmp.ne.s32.totalorder %s3689_s25, %s3685_s24 }
   0x9   : > { %s4988_s11 = smov (%p30_p0, %s29_s11), 0  ;;  %s4990_s12 = smov (!%p30_p0, %s32_s12), %s3709_s30 }
   0xa   : > { %s191_s13 = ssub.s32 %s3705_s29, %s4988_s11  ;;  %p3808_p3 = por %p206_p2, %p205_p1 }
   0xb   : > { %p34_p4 = scmp.ge.s32.totalorder %s4990_s12, 2  ;;  %p212_p6 = scmp.eq.s32.totalorder %s3249_s10, 5 }
   0xc   : > { %p3252_p7 = scmp.ge.s32.totalorder %s3713_s8, 1  ;;  %p260_p9 = scmp.lt.s32.totalorder %s3713_s8, 7 }
   0xd   : > { %s4992_s12 = smov (%p34_p4, %s4990_s12), 0  ;;  %p3817_p8 = por %p212_p6, %p211_p5 }
   0xe   : > { %s190_s16 = ssub.s32 %s3709_s30, %s4992_s12  ;;  %s195_s17 = sadd.s32 1, %s3693_s26 }
   0xf   : > { %s192_s18 = sor.u32 %s191_s13, %s190_s16  ;;  %p261_p10 = pnand %p3252_p7, %p260_p9 }
  0x10   : > { %p193_p11 = scmp.eq.s32.totalorder %s192_s18, 0 }
  0x11   : > { %264 = sbr.rel (%p261_p10) target bundleno = 1136 (0x470), region = 48 }
  0x12   : > { %s3826_s19 = scalar_select %p193_p11, %s3693_s26, %s195_s17  }
  0x16   : > { %v325_v0 = vld [vmem:[%s4937_s1] sm:$0xff]  ;;  %p296_p12 = scmp.lt.s32.totalorder %s3701_s28, 1  ;;  %p298_p13 = scmp.lt.s32.totalorder %s3697_s27, 2  ;;  %vm391_vm0 = vcmask 1043456   ;;  %vm330_vm1 = vcmask 31744   ;;  %v1026_v21 = vld [vmem:[%s4938_s2 + $0x8] sm:$0xff]  ;;  %v542_v33 = vlaneseq }
  0x17   : > { %327 = vst [vmem:[#allocation1] ss:$2 sm:$0xff] %v325_v0  ;;  %3489 = vmatpush.msra.mxu3 %v1026_v21  ;;  %v1025_v24 = vld [vmem:[%s4938_s2] sm:$0xff]  ;;  %v3361_v26 = vld [vmem:[%s4938_s2 + $0x38] sm:$0xff]  ;;  %v3360_v28 = vld [vmem:[%s4938_s2 + $0x30] sm:$0xff]  ;;  %vm1232_vm2 = vcmask 130048  }
  0x18   : > { %s297_s22 = scalar_select %p296_p12, %s3701_s28, 1  ;;  %v3921_v36 = vshrl.u32 %v542_v33, 7  ;;  %vm905_vm3 = vcmask 1041408   ;;  %vm1727_vm4 = vcmask 1046528  }
  0x19   : > { %s299_s23 = scalar_select %p298_p13, %s3697_s27, 2  ;;  %3490 = vmatpush.msra.mxu3 %v1025_v24 }
  0x1a   : > { %s3493_s9 = smul.u32 60, %s297_s22  ;;  %v3924_v37 = vadd.s32 32, %v3921_v36  ;;  %v3936_v43 = vadd.s32 8, %v3921_v36  ;;  %v3957_v55 = vadd.s32 48, %v3921_v36  ;;  %v3967_v62 = vadd.s32 24, %v3921_v36 }
  0x1b   : > { %s3492_s10 = smul.u32 20, %s299_s23 }
  0x1c   : > { %v595_v41 = vand.u32 15, %v3924_v37  ;;  %v4951_v46 = vand.u32 15, %v3936_v43  ;;  %v609_v59 = vand.u32 15, %v3957_v55  ;;  %s3494_s22 = smul.u32 12, %s3697_s27 }
  0x1d   : > { %s302_s13 = sadd.s32 %s3493_s9, %s3492_s10  ;;  %s3495_s23 = smul.u32 36, %s3701_s28 }
  0x1e   : > { %v328_v1 = vld.sshfl [vmem:[#allocation1] sm:$0xff pattern:$0x75316420]  ;;  %s3253_s16 = sshll.u32 %s302_s13, 3  ;;  %v807_v44 = vadd.s32 4294967294, %v595_v41  ;;  %v1648_v52 = vadd.s32 1, %v4951_v46 }
  0x1f   : > { %3487 = vmatpush.msk.msra.mxu1 %vm391_vm0, %v328_v1  ;;  %s3838_s20 = scalar_lea.vmem %s4936_s0, %s3253_s16  ;;  %v329_v2 = vld.sshfl [vmem:[#allocation1 + $0x8] sm:$0xff pattern:$0x75316420]  ;;  %3254 = vmatpush.msk.msra.mxu0 %vm391_vm0, %v328_v1  ;;  %v809_v63 = vadd.s32 4294967294, %v609_v59  ;;  %s293_s16 = sand.u32 1, %s3689_s25  }
  0x20   : > { %v3841_v3 = vld [vmem:[%s3838_s20 + $0x90] sm:$0xff]  ;;  %v305_v4 = vld [vmem:[%s3838_s20] sm:$0xff]  ;;  %3488 = vmatpush.msk.msra.mxu2 %vm391_vm0, %v328_v1  ;;  %v306_v5 = vld [vmem:[%s3838_s20 + $0x8] sm:$0xff]  ;;  %vm827_vm5 = vcmp.ge.s32.totalorder %v807_v44, 0  ;;  %vm1688_vm6 = vcmp.lt.s32.totalorder %v1648_v52, 16  ;;  %v4950_v1 = vand.u32 15, %v3967_v62  ;;  %s3157_s9 = sadd.s32 %s3495_s23, %s3494_s22 }
  0x21   : > { %3275 = vmatpush.msk.msrb.mxu1 %vm391_vm0, %v329_v2  ;;  %3255 = vmatmul.msk.f32.vlgmr.msra.gmra.mxu0 %vm330_vm1, %v305_v4  ;;  %v307_v6 = vld [vmem:[%s3838_s20 + $0x10] sm:$0xff]  ;;  %v308_v7 = vld [vmem:[%s3838_s20 + $0x18] sm:$0xff]  ;;  %v309_v8 = vld [vmem:[%s3838_s20 + $0x20] sm:$0xff]  ;;  %vm829_vm7 = vcmp.ge.s32.totalorder %v809_v63, 0  ;;  %s3484_s10 = sshll.u32 %s3157_s9, 3  ;;  %s3146_s28 = scalar_lea.sflag [#allocation3], %s293_s16 }
  0x22   : > { %3273 = vmatmul.msk.f32.vlgmr.msra.gmra.mxu1 %vm330_vm1, %v3841_v3  ;;  %v310_v9 = vld [vmem:[%s3838_s20 + $0x28] sm:$0xff]  ;;  %v311_v10 = vld [vmem:[%s3838_s20 + $0x30] sm:$0xff]  ;;  %v312_v11 = vld [vmem:[%s3838_s20 + $0x38] sm:$0xff]  ;;  %1444 = vmatpush.msrb.mxu0 %v1026_v21  ;;  %s3159_s18 = scalar_lea.hbm %s4943_s7, %s3484_s10  ;;  %s3639_s13 = scalar_lea.hbm %s4943_s7, 576 }
  0x23   : > { %v313_v12 = vld [vmem:[%s3838_s20 + $0x40] sm:$0xff]  ;;  %v314_v13 = vld [vmem:[%s3838_s20 + $0x48] sm:$0xff]  ;;  %v315_v14 = vld [vmem:[%s3838_s20 + $0x50] sm:$0xff]  ;;  %1926 = vmatpush.msra.mxu1 %v3361_v26  ;;  %s3162_s27 = sshll.u32 %s3159_s18, 4  ;;  %s3163_s27 = int_to_ptr.hbm [resolvable:$true] %s3162_s27 }
  0x24   : > { %v316_v15 = vld [vmem:[%s3838_s20 + $0x58] sm:$0xff]  ;;  %v317_v16 = vld [vmem:[%s3838_s20 + $0x60] sm:$0xff]  ;;  %v318_v17 = vld [vmem:[%s3838_s20 + $0x68] sm:$0xff]  ;;  %1445 = vmatpush.msrb.mxu0 %v1025_v24  ;;  %s3633_s22 = sshra.s32 %s3163_s27, 4  ;;  %s3634_s22 = int_to_ptr.hbm [resolvable:$true] %s3633_s22 }
  0x25   : > { %v319_v18 = vld [vmem:[%s3838_s20 + $0x70] sm:$0xff]  ;;  %v320_v19 = vld [vmem:[%s3838_s20 + $0x78] sm:$0xff]  ;;  %v321_v25 = vld [vmem:[%s3838_s20 + $0x80] sm:$0xff]  ;;  %1927 = vmatpush.msra.mxu1 %v3360_v28  ;;  %v4013_v28 = vadd.s32 80, %v3921_v36  ;;  %s3635_s23 = scalar_lea.hbm %s3634_s22, 96  ;;  %p3640_p4 = scmp.lt.s32.totalorder %s3634_s22, %s4943_s7 }
  0x26   : > { %v324_v22 = vld [vmem:[%s3838_s20 + $0x98] sm:$0xff]  ;;  %v322_v30 = vld [vmem:[%s3838_s20 + $0x88] sm:$0xff]  ;;  %s3491_s20 = smul.u32 96, %s293_s16  ;;  %p3636_p0 = scmp.ne.s32.totalorder %s3634_s22, %s3635_s23 }
  0x27   : > { %3274 = vmatmul.msk.f32.vlgmr.msra.gmra.mxu2 %vm330_vm1, %v324_v22  ;;  %v637_v33 = vand.u32 15, %v4013_v28  ;;  %p3641_p5 = scmp.lt.s32.totalorder %s3639_s13, %s3635_s23 }
  0x28   : > { %s4865_s21 = scalar_lea.vmem [#allocation2], %s3491_s20  ;;  %p3637_p1 = pnand %p3636_p0, %p3808_p3 }
  0x29   : > { %3256 = vmatmul.msk.f32.gmra.mxu0 %vm330_vm1, %v306_v5  ;;  %v813_v44 = vadd.s32 4294967294, %v637_v33  ;;  %s3160_s20 = sshll.u32 %s4865_s21, 4  ;;  %p3642_p6 = por %p3641_p5, %p3640_p4  ;;  %s3161_s20 = int_to_ptr.vmem [resolvable:$true] %s3160_s20 }
  0x2a   : > { %3276 = vmatmul.msk.f32.vlgmr.msrb.gmra.mxu1 %vm330_vm1, %v305_v4  ;;  %p3638_p2 = pneg %p3637_p1 }
  0x2b   : > { %vm833_vm11 = vcmp.ge.s32.totalorder %v813_v44, 0 }
  0x2c   : > { %p3643_p7 = pnand %p3642_p6, %p3638_p2 }
  0x31   : > { %3257 = vmatmul.msk.f32.gmra.mxu0 %vm330_vm1, %v307_v6 }
  0x32   : > { %3277 = vmatmul.msk.f32.gmra.mxu1 %vm330_vm1, %v306_v5 }
  0x39   : > { %3258 = vmatmul.msk.f32.gmra.mxu0 %vm330_vm1, %v308_v7 }
  0x3a   : > { %3278 = vmatmul.msk.f32.gmra.mxu1 %vm330_vm1, %v307_v6  ;;  %v1650_v6 = vadd.s32 1, %v4950_v1 }
  0x3c   : > { %vm1690_vm8 = vcmp.lt.s32.totalorder %v1650_v6, 16  ;;  %v4051_v6 = vadd.s32 72, %v3921_v36 }
  0x41   : > { %3259 = vmatmul.msk.f32.gmra.mxu0 %vm330_vm1, %v309_v8 }
  0x42   : > { %3279 = vmatmul.msk.f32.gmra.mxu1 %vm330_vm1, %v308_v7 }
  0x49   : > { %3260 = vmatmul.msk.f32.gmra.mxu0 %vm330_vm1, %v310_v9 }
  0x4a   : > { %3280 = vmatmul.msk.f32.gmra.mxu1 %vm330_vm1, %v309_v8 }
  0x51   : > { %3261 = vmatmul.msk.f32.gmra.mxu0 %vm330_vm1, %v311_v10 }
  0x52   : > { %3281 = vmatmul.msk.f32.gmra.mxu1 %vm330_vm1, %v310_v9  ;;  %v3985_v9 = vadd.s32 64, %v3921_v36 }
  0x59   : > { %3262 = vmatmul.msk.f32.gmra.mxu0 %vm330_vm1, %v312_v11 }
  0x5a   : > { %3282 = vmatmul.msk.f32.gmra.mxu1 %vm330_vm1, %v311_v10 }
  0x61   : > { %3263 = vmatmul.msk.f32.gmra.mxu0 %vm330_vm1, %v313_v12 }
  0x62   : > { %3283 = vmatmul.msk.f32.gmra.mxu1 %vm330_vm1, %v312_v11 }
  0x69   : > { %3264 = vmatmul.msk.f32.gmra.mxu0 %vm330_vm1, %v314_v13 }
  0x6a   : > { %3284 = vmatmul.msk.f32.gmra.mxu1 %vm330_vm1, %v313_v12 }
  0x71   : > { %3265 = vmatmul.msk.f32.gmra.mxu0 %vm330_vm1, %v315_v14 }
  0x72   : > { %3285 = vmatmul.msk.f32.gmra.mxu1 %vm330_vm1, %v314_v13  ;;  %v623_v13 = vand.u32 15, %v3985_v9 }
  0x79   : > { %3266 = vmatmul.msk.f32.gmra.mxu0 %vm330_vm1, %v316_v15 }
  0x7a   : > { %3286 = vmatmul.msk.f32.gmra.mxu1 %vm330_vm1, %v315_v14 }
  0x81   : > { %3267 = vmatmul.msk.f32.gmra.mxu0 %vm330_vm1, %v317_v16 }
  0x82   : > { %3287 = vmatmul.msk.f32.gmra.mxu1 %vm330_vm1, %v316_v15 }
  0x89   : > { %3268 = vmatmul.msk.f32.gmra.mxu0 %vm330_vm1, %v318_v17 }
  0x8a   : > { %3288 = vmatmul.msk.f32.gmra.mxu1 %vm330_vm1, %v317_v16  ;;  %v3995_v16 = vadd.s32 40, %v3921_v36 }
  0x91   : > { %3269 = vmatmul.msk.f32.gmra.mxu0 %vm330_vm1, %v319_v18 }
  0x92   : > { %3289 = vmatmul.msk.f32.gmra.mxu1 %vm330_vm1, %v318_v17  ;;  %v811_v17 = vadd.s32 4294967294, %v623_v13 }
  0x94   : > { %vm831_vm9 = vcmp.ge.s32.totalorder %v811_v17, 0 }
  0x99   : > { %3270 = vmatmul.msk.f32.gmra.mxu0 %vm330_vm1, %v320_v19 }
  0x9a   : > { %3290 = vmatmul.msk.f32.gmra.mxu1 %vm330_vm1, %v319_v18 }
  0x9e   : > { %v413_v23 = vpop.f32.mrf.mxu0 }
  0x9f   : > { %v461_v20 = vpop.f32.mrf.mxu1 }
  0xa1   : > { %3271 = vmatmul.msk.f32.gmra.mxu0 %vm330_vm1, %v321_v25 }
  0xa2   : > { %3291 = vmatmul.msk.f32.gmra.mxu1 %vm330_vm1, %v320_v19  ;;  %v4948_v19 = vand.u32 15, %v3995_v16 }
  0xa4   : > { %v1652_v24 = vadd.s32 1, %v4948_v19 }
  0xa6   : > { %v415_v29 = vpop.f32.mrf.mxu0  ;;  %vm1692_vm10 = vcmp.lt.s32.totalorder %v1652_v24, 16 }
  0xa7   : > { %v3906_v27 = vpop.f32.mrf.mxu1 }
  0xa8   : > { %v1728_v48 = vrot.slane %v3906_v27, 1 }
  0xa9   : > { %3272 = vmatmul.msk.f32.gmra.mxu0 %vm330_vm1, %v322_v30 }
  0xaa   : > { %3292 = vmatmul.msk.f32.gmra.mxu1 %vm330_vm1, %v321_v25 }
  0xae   : > { %v417_v32 = vpop.f32.mrf.mxu0 }
  0xaf   : > { %v3914_v31 = vpop.f32.mrf.mxu1 }
  0xb0   : > { %v1729_v45 = vrot.slane %v3914_v31, 1 }
  0xb2   : > { %3293 = vmatmul.msk.f32.gmra.mxu1 %vm330_vm1, %v322_v30  ;;  %v1730_v50 = vsel %vm1727_vm4, %v1728_v48, %v1729_v45 }
  0xb6   : > { %v419_v35 = vpop.f32.mrf.mxu0 }
  0xb7   : > { %v3917_v34 = vpop.f32.mrf.mxu1 }
  0xb8   : > { %v909_v39 = vrot.slane %v3917_v34, 6  ;;  %v1731_v53 = vrot.slane %v3917_v34, 1 }
  0xba   : > { %3294 = vmatmul.msk.f32.gmra.mxu1 %vm330_vm1, %v3841_v3  ;;  %v1732_v56 = vsel %vm1727_vm4, %v1729_v45, %v1731_v53 }
  0xbb   : > { %v1830_v60 = vsel %vm1688_vm6, %v1732_v56, 0.0 }
  0xbf   : > { %v3926_v38 = vpop.f32.mrf.mxu1 }
  0xc0   : > { %v911_v40 = vrot.slane %v3926_v38, 6  ;;  %v1733_v0 = vrot.slane %v3926_v38, 1 }
  0xc2   : > { %3295 = vmatmul.msk.f32.gmra.mxu1 %vm330_vm1, %v324_v22  ;;  %v912_v42 = vsel %vm905_vm3, %v909_v39, %v911_v40  ;;  %v1734_v4 = vsel %vm1727_vm4, %v1731_v53, %v1733_v0 }
  0xc3   : > { %3321 = vmatmul.msk.f32.vlgmr.msra.gmra.mxu3 %vm1232_vm2, %v912_v42  ;;  %v4023_v42 = vadd.s32 56, %v3921_v36 }
  0xc7   : > { %v3943_v47 = vpop.f32.mrf.mxu1 }
  0xc8   : > { %v913_v49 = vrot.slane %v3943_v47, 6  ;;  %v1735_v7 = vrot.slane %v3943_v47, 1 }
  0xca   : > { %3362 = vmatmul.msk.f32.vlgmr.msra.gmra.mxu1 %vm1232_vm2, %v1730_v50  ;;  %v914_v51 = vsel %vm905_vm3, %v911_v40, %v913_v49  ;;  %v1736_v10 = vsel %vm1727_vm4, %v1733_v0, %v1735_v7 }
  0xcb   : > { %v1009_v54 = vsel %vm827_vm5, %v914_v51, 0.0  ;;  %v1832_v14 = vsel %vm1690_vm8, %v1736_v10, 0.0  ;;  %v4946_v10 = vand.u32 15, %v4051_v6 }
  0xcc   : > { %3322 = vmatmul.msk.f32.gmra.mxu3 %vm1232_vm2, %v1009_v54 }
  0xcf   : > { %v3960_v57 = vpop.f32.mrf.mxu1 }
  0xd0   : > { %v915_v58 = vrot.slane %v3960_v57, 6  ;;  %v1737_v18 = vrot.slane %v3960_v57, 1  ;;  %v1119_v37 = vrot.slane %v3960_v57, 7 }
  0xd2   : > { %3363 = vmatmul.msk.f32.gmra.mxu1 %vm1232_vm2, %v1830_v60  ;;  %v916_v61 = vsel %vm905_vm3, %v913_v49, %v915_v58  ;;  %v1738_v22 = vsel %vm1727_vm4, %v1735_v7, %v1737_v18  ;;  %v4947_v49 = vand.u32 15, %v4023_v42  ;;  %v4041_v60 = vadd.s32 96, %v3921_v36 }
  0xd4   : > { %3323 = vmatmul.msk.f32.gmra.mxu3 %vm1232_vm2, %v916_v61  ;;  %v1654_v54 = vadd.s32 1, %v4947_v49  ;;  %v4963_v28 = vand.u32 15, %v4041_v60 }
  0xd6   : > { %vm1694_vm12 = vcmp.lt.s32.totalorder %v1654_v54, 16 }
  0xd7   : > { %v3974_v2 = vpop.f32.mrf.mxu1 }
  0xd8   : > { %v917_v3 = vrot.slane %v3974_v2, 6  ;;  %v1739_v25 = vrot.slane %v3974_v2, 1 }
  0xda   : > { %3364 = vmatmul.msk.f32.gmra.mxu1 %vm1232_vm2, %v1734_v4  ;;  %v918_v5 = vsel %vm905_vm3, %v915_v58, %v917_v3  ;;  %v1740_v29 = vsel %vm1727_vm4, %v1737_v18, %v1739_v25  ;;  %v1656_v18 = vadd.s32 1, %v4946_v10 }
  0xdb   : > { %v1011_v8 = vsel %vm829_vm7, %v918_v5, 0.0  ;;  %v1834_v35 = vsel %vm1692_vm10, %v1740_v29, 0.0  ;;  %vm1109_vm10 = vcmask 1040384  }
  0xdc   : > { %3324 = vmatmul.msk.f32.gmra.mxu3 %vm1232_vm2, %v1011_v8  ;;  %vm1696_vm14 = vcmp.lt.s32.totalorder %v1656_v18, 16 }
  0xdf   : > { %v3988_v11 = vpop.f32.mrf.mxu1 }
  0xe0   : > { %v919_v12 = vrot.slane %v3988_v11, 6  ;;  %v1741_v45 = vrot.slane %v3988_v11, 1  ;;  %v1123_v55 = vrot.slane %v3988_v11, 7 }
  0xe2   : > { %3365 = vmatmul.msk.f32.gmra.mxu1 %vm1232_vm2, %v1832_v14  ;;  %v920_v15 = vsel %vm905_vm3, %v917_v3, %v919_v12  ;;  %v1742_v52 = vsel %vm1727_vm4, %v1739_v25, %v1741_v45  ;;  %v4956_v3 = vand.u32 15, %v4041_v60 }
  0xe4   : > { %3325 = vmatmul.msk.f32.gmra.mxu3 %vm1232_vm2, %v920_v15  ;;  %v815_v7 = vadd.s32 4294967294, %v4956_v3 }
  0xe6   : > { %vm835_vm13 = vcmp.ge.s32.totalorder %v815_v7, 0 }
  0xe7   : > { %v4002_v20 = vpop.f32.mrf.mxu1 }
  0xe8   : > { %v921_v21 = vrot.slane %v4002_v20, 6  ;;  %v1743_v56 = vrot.slane %v4002_v20, 1 }
  0xea   : > { %3366 = vmatmul.msk.f32.gmra.mxu1 %vm1232_vm2, %v1738_v22  ;;  %v922_v23 = vsel %vm905_vm3, %v919_v12, %v921_v21  ;;  %v1744_v61 = vsel %vm1727_vm4, %v1741_v45, %v1743_v56 }
  0xeb   : > { %v1013_v26 = vsel %vm831_vm9, %v922_v23, 0.0  ;;  %v1836_v4 = vsel %vm1694_vm12, %v1744_v61, 0.0  ;;  %v4069_v23 = vadd.s32 112, %v3921_v36 }
  0xec   : > { %3326 = vmatmul.msk.f32.gmra.mxu3 %vm1232_vm2, %v1013_v26 }
  0xed   : > { %v4955_v29 = vand.u32 15, %v4069_v23  ;;  %v4964_v60 = vand.u32 15, %v4069_v23 }
  0xef   : > { %v4016_v30 = vpop.f32.mrf.mxu1  ;;  %v817_v44 = vadd.s32 4294967294, %v4955_v29 }
  0xf0   : > { %v923_v32 = vrot.slane %v4016_v30, 6  ;;  %v1745_v8 = vrot.slane %v4016_v30, 1 }
  0xf1   : > { %vm837_vm15 = vcmp.ge.s32.totalorder %v817_v44, 0 }
  0xf2   : > { %3367 = vmatmul.msk.f32.gmra.mxu1 %vm1232_vm2, %v1834_v35  ;;  %v924_v40 = vsel %vm905_vm3, %v921_v21, %v923_v32  ;;  %v1746_v15 = vsel %vm1727_vm4, %v1743_v56, %v1745_v8 }
  0xf4   : > { %3327 = vmatmul.msk.f32.gmra.mxu3 %vm1232_vm2, %v924_v40  ;;  %v4079_v40 = vadd.s32 88, %v3921_v36 }
  0xf7   : > { %v4030_v50 = vpop.f32.mrf.mxu1 }
  0xf8   : > { %v925_v51 = vrot.slane %v4030_v50, 6  ;;  %v1747_v21 = vrot.slane %v4030_v50, 1 }
  0xfa   : > { %3368 = vmatmul.msk.f32.gmra.mxu1 %vm1232_vm2, %v1742_v52  ;;  %v926_v53 = vsel %vm905_vm3, %v923_v32, %v925_v51  ;;  %v1748_v24 = vsel %vm1727_vm4, %v1745_v8, %v1747_v21 }
  0xfb   : > { %v1015_v58 = vsel %vm833_vm11, %v926_v53, 0.0  ;;  %v1838_v32 = vsel %vm1696_vm14, %v1748_v24, 0.0  ;;  %v463_v24 = vpop.f32.mrf.mxu2 }
  0xfc   : > { %3328 = vmatmul.msk.f32.gmra.mxu3 %vm1232_vm2, %v1015_v58 }
  0xff   : > { %v4044_v63 = vpop.f32.mrf.mxu1 }
 0x100   : > { %v927_v0 = vrot.slane %v4044_v63, 6  ;;  %v1749_v45 = vrot.slane %v4044_v63, 1 }
 0x102   : > { %3369 = vmatmul.msk.f32.gmra.mxu1 %vm1232_vm2, %v1836_v4  ;;  %v928_v5 = vsel %vm905_vm3, %v925_v51, %v927_v0  ;;  %v4945_v51 = vand.u32 15, %v4079_v40  ;;  %v1750_v54 = vsel %vm1727_vm4, %v1747_v21, %v1749_v45 }
 0x104   : > { %3329 = vmatmul.msk.f32.gmra.mxu3 %vm1232_vm2, %v928_v5  ;;  %v1658_v58 = vadd.s32 1, %v4945_v51  ;;  %v4100_v5 = vadd.s32 128, %v3921_v36 }
 0x106   : > { %vm1698_vm0 = vcmp.lt.s32.totalorder %v1658_v58, 16  ;;  %v4965_v23 = vand.u32 15, %v4100_v5 }
 0x107   : > { %v4058_v12 = vpop.f32.mrf.mxu1 }
 0x108   : > { %v929_v14 = vrot.slane %v4058_v12, 6  ;;  %v1751_v61 = vrot.slane %v4058_v12, 1 }
 0x10a   : > { %3370 = vmatmul.msk.f32.gmra.mxu1 %vm1232_vm2, %v1746_v15  ;;  %v930_v17 = vsel %vm905_vm3, %v927_v0, %v929_v14  ;;  %v3297_v0 = vld [vmem:[%s4938_s2 + $0x18] sm:$0xff]  ;;  %v1752_v7 = vsel %vm1727_vm4, %v1749_v45, %v1751_v61 }
 0x10b   : > { %v1017_v22 = vsel %vm835_vm13, %v930_v17, 0.0  ;;  %1307 = vmatpush.msrb.mxu2 %v3297_v0  ;;  %v4954_v17 = vand.u32 15, %v4100_v5  ;;  %v1840_v18 = vsel %vm1698_vm0, %v1752_v7, 0.0  ;;  %v4134_v7 = vadd.s32 144, %v3921_v36 }
 0x10c   : > { %3330 = vmatmul.msk.f32.gmra.mxu3 %vm1232_vm2, %v1017_v22  ;;  %v4113_v22 = vadd.s32 104, %v3921_v36 }
 0x10d   : > { %v4966_v5 = vand.u32 15, %v4134_v7 }
 0x10e   : > { %v4944_v44 = vand.u32 15, %v4113_v22 }
 0x10f   : > { %v4072_v25 = vpop.f32.mrf.mxu1 }
 0x110   : > { %v931_v26 = vrot.slane %v4072_v25, 6  ;;  %v1660_v58 = vadd.s32 1, %v4944_v44 }
 0x112   : > { %3371 = vmatmul.msk.f32.gmra.mxu1 %vm1232_vm2, %v1838_v32  ;;  %v932_v35 = vsel %vm905_vm3, %v929_v14, %v931_v26  ;;  %v3296_v14 = vld [vmem:[%s4938_s2 + $0x10] sm:$0xff]  ;;  %v1753_v32 = vrot.slane %v4072_v25, 1  ;;  %vm1700_vm5 = vcmp.lt.s32.totalorder %v1660_v58, 16 }
 0x113   : > { %1308 = vmatpush.msrb.mxu2 %v3296_v14 }
 0x114   : > { %3331 = vmatmul.msk.f32.gmra.mxu3 %vm1232_vm2, %v932_v35  ;;  %v3383_v35 = vld [vmem:[%s4938_s2 + $0x48] sm:$0xff] }
 0x115   : > { %2288 = vmatpush.msra.mxu2 %v3383_v35  ;;  %v4146_v35 = vadd.s32 120, %v3921_v36 }
 0x117   : > { %v4086_v52 = vpop.f32.mrf.mxu1 }
 0x118   : > { %v933_v53 = vrot.slane %v4086_v52, 6  ;;  %v1755_v0 = vrot.slane %v4086_v52, 1 }
 0x11a   : > { %3372 = vmatmul.msk.f32.gmra.mxu1 %vm1232_vm2, %v1750_v54  ;;  %v934_v56 = vsel %vm905_vm3, %v931_v26, %v933_v53  ;;  %v819_v26 = vadd.s32 4294967294, %v4954_v17  ;;  %v1754_v54 = vsel %vm1727_vm4, %v1751_v61, %v1753_v32  ;;  %v1756_v14 = vsel %vm1727_vm4, %v1753_v32, %v1755_v0  ;;  %v4139_v61 = vpop.f32.mrf.mxu0 }
 0x11b   : > { %v1019_v4 = vsel %vm837_vm15, %v934_v56, 0.0  ;;  %v1842_v24 = vsel %vm1700_vm5, %v1756_v14, 0.0 }
 0x11c   : > { %3332 = vmatmul.msk.f32.gmra.mxu3 %vm1232_vm2, %v1019_v4  ;;  %vm839_vm1 = vcmp.ge.s32.totalorder %v819_v26, 0 }
 0x11f   : > { %v4103_v8 = vpop.f32.mrf.mxu1 }
 0x120   : > { %v935_v15 = vrot.slane %v4103_v8, 6 }
 0x122   : > { %3373 = vmatmul.msk.f32.gmra.mxu1 %vm1232_vm2, %v1840_v18  ;;  %v936_v21 = vsel %vm905_vm3, %v933_v53, %v935_v15 }
 0x124   : > { %3333 = vmatmul.msk.f32.gmra.mxu3 %vm1232_vm2, %v936_v21  ;;  %v4952_v21 = vand.u32 15, %v4134_v7 }
 0x126   : > { %v821_v32 = vadd.s32 4294967294, %v4952_v21 }
 0x127   : > { %v4123_v45 = vpop.f32.mrf.mxu1 }
 0x128   : > { %v937_v53 = vrot.slane %v4123_v45, 6  ;;  %vm841_vm6 = vcmp.ge.s32.totalorder %v821_v32, 0  ;;  %v1759_v10 = vrot.slane %v4123_v45, 1  ;;  %v3338_v32 = vld [vmem:[%s4938_s2 + $0x20] sm:$0xff] }
 0x12a   : > { %3374 = vmatmul.msk.f32.gmra.mxu1 %vm1232_vm2, %v1754_v54  ;;  %v938_v56 = vsel %vm905_vm3, %v935_v15, %v937_v53  ;;  %v1757_v54 = vrot.slane %v4103_v8, 1 }
 0x12b   : > { %v1021_v4 = vsel %vm839_vm1, %v938_v56, 0.0  ;;  %v4949_v56 = vand.u32 15, %v4146_v35 }
 0x12c   : > { %3334 = vmatmul.msk.f32.gmra.mxu3 %vm1232_vm2, %v1021_v4  ;;  %v4155_v4 = vpop.f32.mrf.mxu0 }
 0x12d   : > { %v1662_v51 = vadd.s32 1, %v4949_v56  ;;  %v906_v56 = vrot.slane %v3906_v27, 6 }
 0x12f   : > { %v4137_v18 = vpop.f32.mrf.mxu1  ;;  %vm1702_vm7 = vcmp.lt.s32.totalorder %v1662_v51, 16 }
 0x130   : > { %v939_v15 = vrot.slane %v4137_v18, 6 }
 0x132   : > { %3375 = vmatmul.msk.f32.gmra.mxu1 %vm1232_vm2, %v1842_v24  ;;  %v940_v26 = vsel %vm905_vm3, %v937_v53, %v939_v15  ;;  %v3339_v53 = vld [vmem:[%s4938_s2 + $0x28] sm:$0xff]  ;;  %v567_v24 = vand.u32 15, %v3921_v36 }
 0x133   : > { %1564 = vmatpush.msra.mxu0 %v3339_v53 }
 0x134   : > { %3335 = vmatmul.msk.f32.gmra.mxu3 %vm1232_vm2, %v940_v26  ;;  %v1758_v26 = vsel %vm1727_vm4, %v1755_v0, %v1757_v54  ;;  %v1027_v53 = vadd.s32 4294967295, %v567_v24  ;;  %v803_v19 = vadd.s32 4294967294, %v567_v24  ;;  %v1760_v0 = vsel %vm1727_vm4, %v1757_v54, %v1759_v10  ;;  %v4177_v1 = vpop.f32.mrf.mxu0 }
 0x135   : > { %1565 = vmatpush.msra.mxu0 %v3338_v32  ;;  %v4188_v32 = vadd.s32 136, %v3921_v36 }
 0x136   : > { %vm1047_vm8 = vcmp.ge.s32.totalorder %v1027_v53, 0  ;;  %vm823_vm9 = vcmp.ge.s32.totalorder %v803_v19, 0  ;;  %v545_v19 = vadd.s32 16, %v3921_v36 }
 0x137   : > { %v4153_v58 = vpop.f32.mrf.mxu1 }
 0x138   : > { %v941_v14 = vrot.slane %v4153_v58, 6 }
 0x13a   : > { %3376 = vmatmul.msk.f32.gmra.mxu1 %vm1232_vm2, %v1758_v26  ;;  %v942_v44 = vsel %vm905_vm3, %v939_v15, %v941_v14  ;;  %v1110_v15 = vrot.slane %v3906_v27, 7 }
 0x13b   : > { %v1023_v49 = vsel %vm841_vm6, %v942_v44, 0.0 }
 0x13c   : > { %3336 = vmatmul.msk.f32.gmra.mxu3 %vm1232_vm2, %v1023_v49  ;;  %v1844_v49 = vsel %vm1702_vm7, %v1760_v0, 0.0  ;;  %v1761_v0 = vrot.slane %v4137_v18, 1 }
 0x13f   : > { %v4173_v26 = vpop.f32.mrf.mxu1 }
 0x140   : > { %v4953_v46 = vrot.slane %v4173_v26, 7  ;;  %v884_v44 = vrot.slane %v4173_v26, 6 }
 0x142   : > { %3377 = vmatmul.msk.f32.gmra.mxu1 %vm1232_vm2, %v1844_v49  ;;  %v1168_v51 = vsel %vm1109_vm10, %v4953_v46, %v1110_v15  ;;  %v964_v54 = vsel %vm905_vm3, %v884_v44, %v906_v56  ;;  %v943_v24 = vsel %vm905_vm3, %v941_v14, %v884_v44  ;;  %v686_v49 = vand.u32 15, %v4188_v32  ;;  %v4198_v44 = vpop.f32.mrf.mxu0 }
 0x143   : > { %v1209_v53 = vsel %vm1047_vm8, %v1168_v51, 0.0  ;;  %v1005_v21 = vsel %vm823_vm9, %v964_v54, 0.0  ;;  %v1111_v46 = vrot.slane %v3914_v31, 7  ;;  %v907_v14 = vrot.slane %v3914_v31, 6 }
 0x144   : > { %3298 = vmatmul.msk.f32.vlgmr.msrb.gmra.mxu2 %vm1232_vm2, %v1209_v53  ;;  %3318 = vmatmul.msk.f32.vlgmr.msrb.gmra.mxu0 %vm1232_vm2, %v1005_v21  ;;  %v581_v51 = vand.u32 15, %v545_v19  ;;  %v1762_v54 = vsel %vm1727_vm4, %v1759_v10, %v1761_v0  ;;  %v1664_v21 = vadd.s32 1, %v686_v49  ;;  %v1113_v19 = vrot.slane %v3917_v34, 7 }
 0x145   : > { %3337 = vmatmul.msk.f32.gmra.mxu3 %vm1232_vm2, %v943_v24  ;;  %v1763_v24 = vrot.slane %v4153_v58, 1  ;;  %v1112_v53 = vsel %vm1109_vm10, %v1110_v15, %v1111_v46  ;;  %v908_v17 = vsel %vm905_vm3, %v906_v56, %v907_v14  ;;  %v910_v15 = vsel %vm905_vm3, %v907_v14, %v909_v39 }
 0x146   : > { %v1029_v29 = vadd.s32 4294967295, %v581_v51  ;;  %v805_v3 = vadd.s32 4294967294, %v581_v51  ;;  %vm1704_vm11 = vcmp.lt.s32.totalorder %v1664_v21, 16  ;;  %v1115_v39 = vrot.slane %v3926_v38, 7 }
 0x147   : > { %v1764_v10 = vsel %vm1727_vm4, %v1761_v0, %v1763_v24  ;;  %vm2089_vm8 = vcmask 1045504  }
 0x148   : > { %vm1049_vm12 = vcmp.ge.s32.totalorder %v1029_v29, 0  ;;  %vm825_vm13 = vcmp.ge.s32.totalorder %v805_v3, 0  ;;  %v1116_v14 = vsel %vm1109_vm10, %v1113_v19, %v1115_v39 }
 0x149   : > { %v1007_v21 = vsel %vm825_vm13, %v910_v15, 0.0 }
 0x14a   : > { %3378 = vmatmul.msk.f32.gmra.mxu1 %vm1232_vm2, %v1762_v54  ;;  %v1114_v54 = vsel %vm1109_vm10, %v1111_v46, %v1113_v19  ;;  %v4215_v56 = vpop.f32.mrf.mxu0  ;;  %v1765_v46 = vrot.slane %v4173_v26, 1 }
 0x14b   : > { %v1211_v51 = vsel %vm1049_vm12, %v1114_v54, 0.0  ;;  %v1117_v54 = vrot.slane %v3943_v47, 7 }
 0x14c   : > { %3299 = vmatmul.msk.f32.gmra.mxu2 %vm1232_vm2, %v1112_v53  ;;  %3319 = vmatmul.msk.f32.gmra.mxu0 %vm1232_vm2, %v908_v17  ;;  %v1846_v53 = vsel %vm1704_vm11, %v1764_v10, 0.0  ;;  %v4219_v17 = vadd.s32 152, %v3921_v36  ;;  %v1766_v0 = vsel %vm1727_vm4, %v1763_v24, %v1765_v46  ;;  %v1031_v10 = vadd.s32 4294967295, %v595_v41 }
 0x14d   : > { %v1788_v24 = vsel %vm1727_vm4, %v1765_v46, %v1728_v48  ;;  %v1118_v15 = vsel %vm1109_vm10, %v1115_v39, %v1117_v54  ;;  %v1120_v48 = vsel %vm1109_vm10, %v1117_v54, %v1119_v37  ;;  %v1121_v46 = vrot.slane %v3974_v2, 7 }
 0x14e   : > { %v700_v3 = vand.u32 15, %v4219_v17  ;;  %vm1051_vm14 = vcmp.ge.s32.totalorder %v1031_v10, 0  ;;  %v1035_v54 = vadd.s32 4294967295, %v623_v13  ;;  %v1037_v13 = vadd.s32 4294967295, %v637_v33 }
 0x14f   : > { %v1122_v39 = vsel %vm1109_vm10, %v1119_v37, %v1121_v46  ;;  %v1124_v10 = vsel %vm1109_vm10, %v1121_v46, %v1123_v55  ;;  %v1127_v37 = vrot.slane %v4016_v30, 7  ;;  %v1039_v33 = vadd.s32 4294967295, %v4963_v28 }
 0x150   : > { %v1666_v36 = vadd.s32 1, %v700_v3  ;;  %vm1055_vm15 = vcmp.ge.s32.totalorder %v1035_v54, 0  ;;  %vm1057_vm0 = vcmp.ge.s32.totalorder %v1037_v13, 0  ;;  %v1133_v54 = vrot.slane %v4058_v12, 7 }
 0x151   : > { %vm1059_vm1 = vcmp.ge.s32.totalorder %v1039_v33, 0  ;;  %v1137_v13 = vrot.slane %v4086_v52, 7 }
 0x152   : > { %3379 = vmatmul.msk.f32.gmra.mxu1 %vm1232_vm2, %v1846_v53  ;;  %v4226_v29 = vpop.f32.mrf.mxu0  ;;  %vm1706_vm3 = vcmp.lt.s32.totalorder %v1666_v36, 16 }
 0x153   : > { %v1848_v19 = vsel %vm1706_vm3, %v1788_v24, 0.0  ;;  %v1125_v24 = vrot.slane %v4002_v20, 7 }
 0x154   : > { %3300 = vmatmul.msk.f32.gmra.mxu2 %vm1232_vm2, %v1211_v51  ;;  %3320 = vmatmul.msk.f32.gmra.mxu0 %vm1232_vm2, %v1007_v21  ;;  %v1213_v51 = vsel %vm1051_vm14, %v1118_v15, 0.0  ;;  %v1033_v21 = vadd.s32 4294967295, %v609_v59 }
 0x155   : > { %v1126_v15 = vsel %vm1109_vm10, %v1123_v55, %v1125_v24  ;;  %v1128_v9 = vsel %vm1109_vm10, %v1125_v24, %v1127_v37 }
 0x156   : > { %vm1053_vm4 = vcmp.ge.s32.totalorder %v1033_v21, 0  ;;  %v1129_v21 = vrot.slane %v4030_v50, 7 }
 0x157   : > { %v1215_v36 = vsel %vm1053_vm4, %v1122_v39, 0.0 }
 0x158   : > { %v1130_v46 = vsel %vm1109_vm10, %v1127_v37, %v1129_v21 }
 0x15a   : > { %3380 = vmatmul.msk.f32.gmra.mxu1 %vm1232_vm2, %v1766_v0  ;;  %v4243_v53 = vpop.f32.mrf.mxu0 }
 0x15c   : > { %3301 = vmatmul.msk.f32.gmra.mxu2 %vm1232_vm2, %v1116_v14  ;;  %3340 = vmatmul.msk.f32.vlgmr.msra.gmra.mxu0 %vm1232_vm2, %v3906_v27  ;;  %v3382_v14 = vld [vmem:[%s4938_s2 + $0x40] sm:$0xff] }
 0x15d   : > { %2289 = vmatpush.msra.mxu2 %v3382_v14  ;;  %v1131_v14 = vrot.slane %v4044_v63, 7 }
 0x15f   : > { %v1134_v24 = vsel %vm1109_vm10, %v1131_v14, %v1133_v54 }
 0x162   : > { %3381 = vmatmul.msk.f32.gmra.mxu1 %vm1232_vm2, %v1848_v19  ;;  %v4250_v41 = vpop.f32.mrf.mxu0 }
 0x164   : > { %3302 = vmatmul.msk.f32.gmra.mxu2 %vm1232_vm2, %v1213_v51  ;;  %3341 = vmatmul.msk.f32.gmra.mxu0 %vm1232_vm2, %v3914_v31  ;;  %v1217_v51 = vsel %vm1055_vm15, %v1126_v15, 0.0  ;;  %v1221_v15 = vsel %vm1059_vm1, %v1134_v24, 0.0 }
 0x16a   : > { %v4260_v0 = vpop.f32.mrf.mxu0 }
 0x16c   : > { %3303 = vmatmul.msk.f32.gmra.mxu2 %vm1232_vm2, %v1120_v48  ;;  %3342 = vmatmul.msk.f32.gmra.mxu0 %vm1232_vm2, %v3917_v34 }
 0x172   : > { %v4269_v59 = vpop.f32.mrf.mxu0 }
 0x173   : > { %4960 = vst [vmem:[#allocation5_spill] sm:$0xff] %v4269_v59 }
 0x174   : > { %3304 = vmatmul.msk.f32.gmra.mxu2 %vm1232_vm2, %v1215_v36  ;;  %3343 = vmatmul.msk.f32.gmra.mxu0 %vm1232_vm2, %v3926_v38  ;;  %v1219_v36 = vsel %vm1057_vm0, %v1130_v46, 0.0 }
 0x17a   : > { %v4279_v19 = vpop.f32.mrf.mxu0 }
 0x17b   : > { %4961 = vst [vmem:[#allocation6_spill] sm:$0xff] %v4279_v19 }
 0x17c   : > { %3305 = vmatmul.msk.f32.gmra.mxu2 %vm1232_vm2, %v1124_v10  ;;  %3344 = vmatmul.msk.f32.gmra.mxu0 %vm1232_vm2, %v3943_v47  ;;  %v1132_v10 = vsel %vm1109_vm10, %v1129_v21, %v1131_v14  ;;  %v1043_v14 = vadd.s32 4294967295, %v4965_v23  ;;  %v4957_v23 = vrot.slane %v3906_v27, 2 }
 0x17e   : > { %vm1063_vm6 = vcmp.ge.s32.totalorder %v1043_v14, 0 }
 0x182   : > { %v4285_v48 = vpop.f32.mrf.mxu0 }
 0x183   : > { %4962 = vst [vmem:[#allocation7_spill] sm:$0xff] %v4285_v48 }
 0x184   : > { %3306 = vmatmul.msk.f32.gmra.mxu2 %vm1232_vm2, %v1217_v51  ;;  %3345 = vmatmul.msk.f32.gmra.mxu0 %vm1232_vm2, %v3960_v57  ;;  %v1135_v51 = vrot.slane %v4072_v25, 7 }
 0x186   : > { %v1136_v37 = vsel %vm1109_vm10, %v1133_v54, %v1135_v51  ;;  %v1138_v21 = vsel %vm1109_vm10, %v1135_v51, %v1137_v13  ;;  %v1143_v54 = vrot.slane %v4137_v18, 7  ;;  %v1145_v51 = vrot.slane %v4153_v58, 7 }
 0x18a   : > { %v457_v39 = vpop.f32.mrf.mxu0 }
 0x18b   : > { %v1139_v39 = vrot.slane %v4103_v8, 7 }
 0x18c   : > { %3307 = vmatmul.msk.f32.gmra.mxu2 %vm1232_vm2, %v1128_v9  ;;  %3346 = vmatmul.msk.f32.gmra.mxu0 %vm1232_vm2, %v3974_v2  ;;  %v1041_v9 = vadd.s32 4294967295, %v4964_v60  ;;  %v1146_v60 = vsel %vm1109_vm10, %v1143_v54, %v1145_v51 }
 0x18e   : > { %vm1061_vm5 = vcmp.ge.s32.totalorder %v1041_v9, 0  ;;  %v3405_v9 = vld [vmem:[%s4939_s3 + $0x18] sm:$0xff] }
 0x18f   : > { %v1223_v46 = vsel %vm1061_vm5, %v1138_v21, 0.0  ;;  %2426 = vmatpush.msrb.mxu3 %v3405_v9  ;;  %v4967_v21 = vrot.slane %v4173_v26, 7 }
 0x192   : > { %v459_v55 = vpop.f32.mrf.mxu0 }
 0x193   : > { %v1141_v55 = vrot.slane %v4123_v45, 7 }
 0x194   : > { %3308 = vmatmul.msk.f32.gmra.mxu2 %vm1232_vm2, %v1219_v36  ;;  %3347 = vmatmul.msk.f32.gmra.mxu0 %vm1232_vm2, %v3988_v11  ;;  %v1140_v36 = vsel %vm1109_vm10, %v1137_v13, %v1139_v39 }
 0x195   : > { %v1144_v24 = vsel %vm1109_vm10, %v1141_v55, %v1143_v54 }
 0x19c   : > { %3309 = vmatmul.msk.f32.gmra.mxu2 %vm1232_vm2, %v1132_v10  ;;  %3348 = vmatmul.msk.f32.gmra.mxu0 %vm1232_vm2, %v4002_v20  ;;  %v1142_v10 = vsel %vm1109_vm10, %v1139_v39, %v1141_v55  ;;  %v4968_v55 = vand.u32 15, %v3936_v43 }
 0x19d   : > { %v1225_v28 = vsel %vm1063_vm6, %v1142_v10, 0.0 }
 0x19e   : > { %v2010_v10 = vadd.s32 2, %v4968_v55 }
 0x1a0   : > { %vm2050_vm9 = vcmp.lt.s32.totalorder %v2010_v10, 16 }
 0x1a4   : > { %3310 = vmatmul.msk.f32.gmra.mxu2 %vm1232_vm2, %v1221_v15  ;;  %3349 = vmatmul.msk.f32.gmra.mxu0 %vm1232_vm2, %v4016_v30  ;;  %v1045_v15 = vadd.s32 4294967295, %v4966_v5 }
 0x1a6   : > { %vm1065_vm7 = vcmp.ge.s32.totalorder %v1045_v15, 0  ;;  %v2095_v15 = vrot.slane %v3926_v38, 2 }
 0x1a7   : > { %v1227_v13 = vsel %vm1065_vm7, %v1146_v60, 0.0  ;;  %v2097_v60 = vrot.slane %v3943_v47, 2  ;;  %v2101_v47 = vrot.slane %v3974_v2, 2  ;;  %v2105_v2 = vrot.slane %v4002_v20, 2  ;;  %v3459_v20 = vld [vmem:[%s4939_s3 + $0x48] sm:$0xff] }
 0x1a8   : > { %2695 = vmatpush.msrb.mxu2 %v3459_v20 }
 0x1ac   : > { %3311 = vmatmul.msk.f32.gmra.mxu2 %vm1232_vm2, %v1136_v37  ;;  %3350 = vmatmul.msk.f32.gmra.mxu0 %vm1232_vm2, %v4030_v50 }
 0x1b4   : > { %3312 = vmatmul.msk.f32.gmra.mxu2 %vm1232_vm2, %v1223_v46  ;;  %3351 = vmatmul.msk.f32.gmra.mxu0 %vm1232_vm2, %v4044_v63  ;;  %v1147_v46 = vsel %vm1109_vm10, %v1145_v51, %v4967_v21 }
 0x1bc   : > { %3313 = vmatmul.msk.f32.gmra.mxu2 %vm1232_vm2, %v1140_v36  ;;  %3352 = vmatmul.msk.f32.gmra.mxu0 %vm1232_vm2, %v4058_v12  ;;  %v2091_v36 = vrot.slane %v3914_v31, 2 }
 0x1be   : > { %v2092_v14 = vsel %vm2089_vm8, %v4957_v23, %v2091_v36 }
 0x1c4   : > { %3314 = vmatmul.msk.f32.gmra.mxu2 %vm1232_vm2, %v1225_v28  ;;  %3353 = vmatmul.msk.f32.gmra.mxu0 %vm1232_vm2, %v4072_v25  ;;  %v2093_v28 = vrot.slane %v3917_v34, 2  ;;  %v4969_v34 = vand.u32 15, %v3967_v62  ;;  %v4970_v62 = vand.u32 15, %v3995_v16  ;;  %v4971_v16 = vand.u32 15, %v4023_v42 }
 0x1c5   : > { %v2107_v42 = vrot.slane %v4016_v30, 2  ;;  %v3445_v30 = vld [vmem:[%s4939_s3 + $0x38] sm:$0xff] }
 0x1c6   : > { %v2094_v31 = vsel %vm2089_vm8, %v2091_v36, %v2093_v28  ;;  %v2096_v43 = vsel %vm2089_vm8, %v2093_v28, %v2095_v15  ;;  %v2012_v51 = vadd.s32 2, %v4969_v34  ;;  %2621 = vmatpush.msrb.mxu1 %v3445_v30 }
 0x1c7   : > { %v4334_v33 = vpop.f32.mrf.mxu2 }
 0x1c8   : > { %vm2052_vm10 = vcmp.lt.s32.totalorder %v2012_v51, 16 }
 0x1cc   : > { %3315 = vmatmul.msk.f32.gmra.mxu2 %vm1232_vm2, %v1144_v24  ;;  %3354 = vmatmul.msk.f32.gmra.mxu0 %vm1232_vm2, %v4086_v52  ;;  %v2192_v24 = vsel %vm2050_vm9, %v2094_v31, 0.0 }
 0x1cf   : > { %v4344_v37 = vpop.f32.mrf.mxu2 }
 0x1d4   : > { %3316 = vmatmul.msk.f32.gmra.mxu2 %vm1232_vm2, %v1227_v13  ;;  %3355 = vmatmul.msk.f32.gmra.mxu0 %vm1232_vm2, %v4103_v8  ;;  %v2098_v13 = vsel %vm2089_vm8, %v2095_v15, %v2097_v60  ;;  %v2016_v15 = vadd.s32 2, %v4971_v16 }
 0x1d5   : > { %v2194_v21 = vsel %vm2052_vm10, %v2098_v13, 0.0 }
 0x1d6   : > { %vm2056_vm12 = vcmp.lt.s32.totalorder %v2016_v15, 16  ;;  %v4973_v15 = vand.u32 15, %v4079_v40 }
 0x1d7   : > { %v4353_v7 = vpop.f32.mrf.mxu2 }
 0x1dc   : > { %3317 = vmatmul.msk.f32.gmra.mxu2 %vm1232_vm2, %v1147_v46  ;;  %3356 = vmatmul.msk.f32.gmra.mxu0 %vm1232_vm2, %v4123_v45  ;;  %v2099_v46 = vrot.slane %v3960_v57, 2  ;;  %v2103_v57 = vrot.slane %v3988_v11, 2  ;;  %v4420_v11 = vpop.f32.mrf.mxu0 }
 0x1de   : > { %v2100_v36 = vsel %vm2089_vm8, %v2097_v60, %v2099_v46  ;;  %v2102_v10 = vsel %vm2089_vm8, %v2099_v46, %v2101_v47  ;;  %v2106_v51 = vsel %vm2089_vm8, %v2103_v57, %v2105_v2  ;;  %v2108_v46 = vsel %vm2089_vm8, %v2105_v2, %v2107_v42 }
 0x1df   : > { %v4361_v39 = vpop.f32.mrf.mxu2  ;;  %v2198_v60 = vsel %vm2056_vm12, %v2106_v51, 0.0  ;;  %v2020_v2 = vadd.s32 2, %v4973_v15  ;;  %v2119_v15 = vrot.slane %v4103_v8, 2  ;;  %v2372_v8 = vld [vmem:[%s4939_s3 + $0x8] sm:$0xff] }
 0x1e1   : > { %vm2060_vm3 = vcmp.lt.s32.totalorder %v2020_v2, 16 }
 0x1e4   : > { %3357 = vmatmul.msk.f32.gmra.mxu0 %vm1232_vm2, %v4137_v18  ;;  %3384 = vmatmul.msk.f32.vlgmr.msra.gmra.mxu2 %vm1232_vm2, %v2092_v14  ;;  %v2014_v14 = vadd.s32 2, %v4970_v62 }
 0x1e6   : > { %vm2054_vm11 = vcmp.lt.s32.totalorder %v2014_v14, 16  ;;  %v2109_v14 = vrot.slane %v4030_v50, 2  ;;  %v2111_v50 = vrot.slane %v4044_v63, 2  ;;  %v4462_v63 = vpop.f32.mrf.mxu1 }
 0x1e7   : > { %v4374_v54 = vpop.f32.mrf.mxu2  ;;  %v2196_v28 = vsel %vm2054_vm11, %v2102_v10, 0.0 }
 0x1e8   : > { %v2112_v16 = vsel %vm2089_vm8, %v2109_v14, %v2111_v50 }
 0x1ec   : > { %3358 = vmatmul.msk.f32.gmra.mxu0 %vm1232_vm2, %v4153_v58  ;;  %3385 = vmatmul.msk.f32.gmra.mxu2 %vm1232_vm2, %v2192_v24  ;;  %v2104_v24 = vsel %vm2089_vm8, %v2101_v47, %v2103_v57  ;;  %v4440_v47 = vpop.f32.mrf.mxu0 }
 0x1ef   : > { %v4380_v5 = vpop.f32.mrf.mxu2 }
 0x1f4   : > { %3359 = vmatmul.msk.f32.gmra.mxu0 %vm1232_vm2, %v4173_v26  ;;  %3386 = vmatmul.msk.f32.gmra.mxu2 %vm1232_vm2, %v2096_v43  ;;  %v3404_v43 = vld [vmem:[%s4939_s3 + $0x10] sm:$0xff] }
 0x1f5   : > { %2427 = vmatpush.msrb.mxu3 %v3404_v43  ;;  %v2113_v43 = vrot.slane %v4058_v12, 2 }
 0x1f7   : > { %v4390_v9 = vpop.f32.mrf.mxu2  ;;  %2485 = vmatpush.msra.mxu3 %v2372_v8 }
 0x1fc   : > { %3387 = vmatmul.msk.f32.gmra.mxu2 %vm1232_vm2, %v2194_v21  ;;  %v3431_v21 = vld [vmem:[%s4939_s3 + $0x28] sm:$0xff] }
 0x1fd   : > { %2547 = vmatpush.msrb.mxu0 %v3431_v21 }
 0x1ff   : > { %v4394_v38 = vpop.f32.mrf.mxu2 }
 0x204   : > { %3388 = vmatmul.msk.f32.gmra.mxu2 %vm1232_vm2, %v2100_v36  ;;  %v4972_v36 = vand.u32 15, %v4051_v6 }
 0x206   : > { %v2018_v62 = vadd.s32 2, %v4972_v36  ;;  %v4974_v36 = vand.u32 15, %v4113_v22 }
 0x207   : > { %v4402_v55 = vpop.f32.mrf.mxu2 }
 0x208   : > { %vm2058_vm13 = vcmp.lt.s32.totalorder %v2018_v62, 16  ;;  %v2022_v62 = vadd.s32 2, %v4974_v36 }
 0x20a   : > { %vm2062_vm14 = vcmp.lt.s32.totalorder %v2022_v62, 16 }
 0x20c   : > { %3389 = vmatmul.msk.f32.gmra.mxu2 %vm1232_vm2, %v2196_v28  ;;  %v2110_v28 = vsel %vm2089_vm8, %v2107_v42, %v2109_v14  ;;  %v2117_v14 = vrot.slane %v4086_v52, 2  ;;  %v4975_v52 = vand.u32 15, %v4146_v35 }
 0x20d   : > { %v2200_v57 = vsel %vm2058_vm13, %v2110_v28, 0.0 }
 0x20e   : > { %v2120_v22 = vsel %vm2089_vm8, %v2117_v14, %v2119_v15 }
 0x20f   : > { %v4406_v31 = vpop.f32.mrf.mxu2 }
 0x214   : > { %3390 = vmatmul.msk.f32.gmra.mxu2 %vm1232_vm2, %v2104_v24  ;;  %v4446_v24 = vpop.f32.mrf.mxu0 }
 0x217   : > { %v4417_v34 = vpop.f32.mrf.mxu2 }
 0x21c   : > { %3391 = vmatmul.msk.f32.gmra.mxu2 %vm1232_vm2, %v2198_v60  ;;  %v2114_v60 = vsel %vm2089_vm8, %v2111_v50, %v2113_v43  ;;  %v4459_v42 = vpop.f32.mrf.mxu0 }
 0x21d   : > { %v2202_v20 = vsel %vm2060_vm3, %v2114_v60, 0.0  ;;  %v2121_v60 = vrot.slane %v4123_v45, 2  ;;  %v2123_v45 = vrot.slane %v4137_v18, 2  ;;  %v3430_v18 = vld [vmem:[%s4939_s3 + $0x20] sm:$0xff] }
 0x21e   : > { %2548 = vmatpush.msrb.mxu0 %v3430_v18 }
 0x21f   : > { %v4423_v13 = vpop.f32.mrf.mxu2  ;;  %v2122_v36 = vsel %vm2089_vm8, %v2119_v15, %v2121_v60  ;;  %v2026_v15 = vadd.s32 2, %v686_v49  ;;  %v1454_v49 = vadd.f32 %v4446_v24, %v4353_v7 }
 0x221   : > { %vm2066_vm15 = vcmp.lt.s32.totalorder %v2026_v15, 16 }
 0x224   : > { %3392 = vmatmul.msk.f32.gmra.mxu2 %vm1232_vm2, %v2108_v46  ;;  %v2115_v46 = vrot.slane %v4072_v25, 2  ;;  %v4467_v40 = vpop.f32.mrf.mxu0 }
 0x226   : > { %v2116_v12 = vsel %vm2089_vm8, %v2113_v43, %v2115_v46  ;;  %v2118_v28 = vsel %vm2089_vm8, %v2115_v46, %v2117_v14  ;;  %v2024_v43 = vadd.s32 2, %v4975_v52  ;;  %v2125_v52 = vrot.slane %v4153_v58, 2 }
 0x227   : > { %v4442_v10 = vpop.f32.mrf.mxu2  ;;  %v2204_v50 = vsel %vm2062_vm14, %v2118_v28, 0.0  ;;  %v2127_v58 = vrot.slane %v4173_v26, 2  ;;  %v2028_v26 = vadd.s32 2, %v700_v3 }
 0x228   : > { %vm2064_vm4 = vcmp.lt.s32.totalorder %v2024_v43, 16  ;;  %v2126_v8 = vsel %vm2089_vm8, %v2123_v45, %v2125_v52 }
 0x229   : > { %v2206_v62 = vsel %vm2064_vm4, %v2122_v36, 0.0  ;;  %v2208_v23 = vsel %vm2066_vm15, %v2126_v8, 0.0  ;;  %v3444_v8 = vld [vmem:[%s4939_s3 + $0x30] sm:$0xff]  ;;  %vm2068_vm0 = vcmp.lt.s32.totalorder %v2028_v26, 16 }
 0x22a   : > { %2622 = vmatpush.msrb.mxu1 %v3444_v8 }
 0x22c   : > { %3393 = vmatmul.msk.f32.gmra.mxu2 %vm1232_vm2, %v2200_v57  ;;  %v4477_v57 = vpop.f32.mrf.mxu1  ;;  %v1573_v25 = vpop.f32.mrf.mxu0 }
 0x22d   : > { %v1629_v15 = vadd.f32 %v1573_v25, %v1454_v49  ;;  %v4976_v25 = vrot.slane %v3906_v27, 2 }
 0x22f   : > { %v4448_v6 = vpop.f32.mrf.mxu2  ;;  %v2150_v49 = vsel %vm2089_vm8, %v2127_v58, %v4976_v25 }
 0x230   : > { %v2210_v8 = vsel %vm2068_vm0, %v2150_v49, 0.0 }
 0x234   : > { %3394 = vmatmul.msk.f32.gmra.mxu2 %vm1232_vm2, %v2112_v16  ;;  %v1935_v2 = vpop.f32.mrf.mxu1  ;;  %v1576_v46 = vpop.f32.mrf.mxu0 }
 0x235   : > { %v1991_v24 = vadd.f32 %v1935_v2, %v1629_v15 }
 0x237   : > { %v4456_v51 = vpop.f32.mrf.mxu2 }
 0x23c   : > { %3395 = vmatmul.msk.f32.gmra.mxu2 %vm1232_vm2, %v2202_v20  ;;  %v1456_v20 = vpop.f32.mrf.mxu3  ;;  %v1938_v14 = vpop.f32.mrf.mxu1 }
 0x23d   : > { %v1457_v19 = vadd.f32 %v1456_v20, %v4361_v39 }
 0x23f   : > { %v4464_v21 = vpop.f32.mrf.mxu2  ;;  %v1630_v59 = vadd.f32 %v1576_v46, %v1457_v19 }
 0x241   : > { %v1992_v3 = vadd.f32 %v1938_v14, %v1630_v59 }
 0x244   : > { %3396 = vmatmul.msk.f32.gmra.mxu2 %vm1232_vm2, %v2116_v12  ;;  %v1459_v35 = vpop.f32.mrf.mxu3  ;;  %v1941_v43 = vpop.f32.mrf.mxu1 }
 0x247   : > { %v4474_v30 = vpop.f32.mrf.mxu2 }
 0x24c   : > { %3397 = vmatmul.msk.f32.gmra.mxu2 %vm1232_vm2, %v2204_v50  ;;  %v1579_v50 = vpop.f32.mrf.mxu0 }
 0x24f   : > { %v4480_v16 = vpop.f32.mrf.mxu2 }
 0x254   : > { %3398 = vmatmul.msk.f32.gmra.mxu2 %vm1232_vm2, %v2120_v22  ;;  %v2124_v22 = vsel %vm2089_vm8, %v2121_v60, %v2123_v45  ;;  %v1582_v60 = vpop.f32.mrf.mxu0  ;;  %v3458_v45 = vld [vmem:[%s4939_s3 + $0x40] sm:$0xff] }
 0x255   : > { %2696 = vmatpush.msrb.mxu2 %v3458_v45 }
 0x257   : > { %v4488_v12 = vpop.f32.mrf.mxu2 }
 0x25c   : > { %3399 = vmatmul.msk.f32.gmra.mxu2 %vm1232_vm2, %v2206_v62  ;;  %v1462_v62 = vpop.f32.mrf.mxu3  ;;  %v1585_v7 = vpop.f32.mrf.mxu0 }
 0x25f   : > { %v4495_v28 = vpop.f32.mrf.mxu2 }
 0x264   : > { %3400 = vmatmul.msk.f32.gmra.mxu2 %vm1232_vm2, %v2124_v22  ;;  %v1944_v22 = vpop.f32.mrf.mxu1  ;;  %v1465_v18 = vpop.f32.mrf.mxu3 }
 0x265   : > { %v1588_v2 = vpop.f32.mrf.mxu0 }
 0x267   : > { %v4503_v36 = vpop.f32.mrf.mxu2 }
 0x26c   : > { %3401 = vmatmul.msk.f32.gmra.mxu2 %vm1232_vm2, %v2208_v23  ;;  %v2128_v23 = vsel %vm2089_vm8, %v2125_v52, %v2127_v58  ;;  %v1947_v52 = vpop.f32.mrf.mxu1  ;;  %v1468_v17 = vpop.f32.mrf.mxu3 }
 0x26f   : > { %v4510_v32 = vpop.f32.mrf.mxu2 }
 0x274   : > { %3402 = vmatmul.msk.f32.gmra.mxu2 %vm1232_vm2, %v2128_v23  ;;  %v1950_v27 = vpop.f32.mrf.mxu1  ;;  %v1471_v46 = vpop.f32.mrf.mxu3  ;;  %v1463_v23 = vadd.f32 %v1462_v62, %v4380_v5  ;;  %v1466_v5 = vadd.f32 %v1465_v18, %v4390_v9 }
 0x276   : > { %v1632_v59 = vadd.f32 %v1582_v60, %v1463_v23  ;;  %v1633_v60 = vadd.f32 %v1585_v7, %v1466_v5 }
 0x277   : > { %v2297_v48 = vpop.f32.mrf.mxu2 }
 0x278   : > { %v4526_v45 = vadd.f32 %v2297_v48, %v1991_v24  ;;  %v1460_v48 = vadd.f32 %v1459_v35, %v4374_v54  ;;  %v1591_v24 = vpop.f32.mrf.mxu0  ;;  %v2371_v54 = vld [vmem:[%s4939_s3] sm:$0xff]  ;;  %v1994_v14 = vadd.f32 %v1944_v22, %v1632_v59  ;;  %v1995_v49 = vadd.f32 %v1947_v52, %v1633_v60 }
 0x279   : > { %2486 = vmatpush.msra.mxu3 %v2371_v54 }
 0x27a   : > { %3406 = vmatmul.msk.f32.vlgmr.msrb.gmra.mxu3 %vm1232_vm2, %v4526_v45  ;;  %v1631_v20 = vadd.f32 %v1579_v50, %v1460_v48 }
 0x27c   : > { %3403 = vmatmul.msk.f32.gmra.mxu2 %vm1232_vm2, %v2210_v8  ;;  %v1993_v19 = vadd.f32 %v1941_v43, %v1631_v20  ;;  %v1953_v35 = vpop.f32.mrf.mxu1  ;;  %v1474_v62 = vpop.f32.mrf.mxu3  ;;  %v1472_v20 = vadd.f32 %v1471_v46, %v4402_v55 }
 0x27d   : > { %v1475_v59 = vadd.f32 %v1474_v62, %v4406_v31 }
 0x27f   : > { %v2300_v15 = vpop.f32.mrf.mxu2 }
 0x280   : > { %v4535_v39 = vadd.f32 %v2300_v15, %v1992_v3  ;;  %v1594_v25 = vpop.f32.mrf.mxu0  ;;  %v1469_v3 = vadd.f32 %v1468_v17, %v4394_v38  ;;  %v1635_v17 = vadd.f32 %v1591_v24, %v1472_v20 }
 0x281   : > { %v1636_v46 = vadd.f32 %v1594_v25, %v1475_v59 }
 0x282   : > { %3407 = vmatmul.msk.f32.gmra.mxu3 %vm1232_vm2, %v4535_v39  ;;  %v1634_v48 = vadd.f32 %v1588_v2, %v1469_v3 }
 0x284   : > { %v1956_v15 = vpop.f32.mrf.mxu1  ;;  %v1477_v9 = vpop.f32.mrf.mxu3  ;;  %v1996_v7 = vadd.f32 %v1950_v27, %v1634_v48 }
 0x285   : > { %v1998_v54 = vadd.f32 %v1956_v15, %v1636_v46  ;;  %v1478_v31 = vadd.f32 %v1477_v9, %v4417_v34 }
 0x287   : > { %v2303_v58 = vpop.f32.mrf.mxu2 }
 0x288   : > { %v4540_v26 = vadd.f32 %v2303_v58, %v1993_v19  ;;  %v1597_v18 = vpop.f32.mrf.mxu0  ;;  %v1997_v58 = vadd.f32 %v1953_v35, %v1635_v17 }
 0x289   : > { %v1637_v62 = vadd.f32 %v1597_v18, %v1478_v31 }
 0x28a   : > { %3408 = vmatmul.msk.f32.gmra.mxu3 %vm1232_vm2, %v4540_v26  ;;  %3432 = vmatmul.msk.f32.vlgmr.msrb.gmra.mxu0 %vm1232_vm2, %v4540_v26 }
 0x28c   : > { %v1959_v2 = vpop.f32.mrf.mxu1  ;;  %v1480_v19 = vpop.f32.mrf.mxu3 }
 0x28d   : > { %v1999_v60 = vadd.f32 %v1959_v2, %v1637_v62  ;;  %v1481_v34 = vadd.f32 %v1480_v19, %v4423_v13 }
 0x28f   : > { %v2306_v50 = vpop.f32.mrf.mxu2 }
 0x290   : > { %v4550_v43 = vadd.f32 %v2306_v50, %v1994_v14  ;;  %v1600_v23 = vpop.f32.mrf.mxu0 }
 0x291   : > { %v1638_v15 = vadd.f32 %v1600_v23, %v1481_v34 }
 0x292   : > { %3409 = vmatmul.msk.f32.gmra.mxu3 %vm1232_vm2, %v4550_v43  ;;  %3433 = vmatmul.msk.f32.gmra.mxu0 %vm1232_vm2, %v4550_v43 }
 0x294   : > { %v1962_v24 = vpop.f32.mrf.mxu1  ;;  %v1483_v14 = vpop.f32.mrf.mxu3 }
 0x295   : > { %v2000_v9 = vadd.f32 %v1962_v24, %v1638_v15  ;;  %v1484_v13 = vadd.f32 %v1483_v14, %v4442_v10 }
 0x297   : > { %v2309_v8 = vpop.f32.mrf.mxu2 }
 0x298   : > { %v4557_v22 = vadd.f32 %v2309_v8, %v1995_v49  ;;  %v1603_v5 = vpop.f32.mrf.mxu0 }
 0x299   : > { %v1639_v20 = vadd.f32 %v1603_v5, %v1484_v13 }
 0x29a   : > { %3410 = vmatmul.msk.f32.gmra.mxu3 %vm1232_vm2, %v4557_v22  ;;  %3434 = vmatmul.msk.f32.gmra.mxu0 %vm1232_vm2, %v4557_v22 }
 0x29b   : > { %3446 = vmatmul.msk.f32.vlgmr.msrb.gmra.mxu1 %vm1232_vm2, %v4557_v22 }
 0x29c   : > { %v1965_v25 = vpop.f32.mrf.mxu1  ;;  %v1486_v3 = vpop.f32.mrf.mxu3 }
 0x29d   : > { %v2001_v19 = vadd.f32 %v1965_v25, %v1639_v20 }
 0x29f   : > { %v2312_v52 = vpop.f32.mrf.mxu2 }
 0x2a0   : > { %v4566_v38 = vadd.f32 %v2312_v52, %v1996_v7  ;;  %v1606_v48 = vpop.f32.mrf.mxu0 }
 0x2a2   : > { %3411 = vmatmul.msk.f32.gmra.mxu3 %vm1232_vm2, %v4566_v38  ;;  %3435 = vmatmul.msk.f32.gmra.mxu0 %vm1232_vm2, %v4566_v38 }
 0x2a3   : > { %3447 = vmatmul.msk.f32.gmra.mxu1 %vm1232_vm2, %v4566_v38 }
 0x2a4   : > { %v1968_v52 = vpop.f32.mrf.mxu1  ;;  %v1489_v17 = vpop.f32.mrf.mxu3 }
 0x2a7   : > { %v2315_v27 = vpop.f32.mrf.mxu2 }
 0x2a8   : > { %v4575_v55 = vadd.f32 %v2315_v27, %v1997_v58  ;;  %v1609_v2 = vpop.f32.mrf.mxu0  ;;  %v1487_v58 = vadd.f32 %v1486_v3, %v4448_v6  ;;  %v1490_v6 = vadd.f32 %v1489_v17, %v4456_v51 }
 0x2aa   : > { %3412 = vmatmul.msk.f32.gmra.mxu3 %vm1232_vm2, %v4575_v55  ;;  %3436 = vmatmul.msk.f32.gmra.mxu0 %vm1232_vm2, %v4575_v55  ;;  %v1640_v27 = vadd.f32 %v1606_v48, %v1487_v58  ;;  %v1641_v62 = vadd.f32 %v1609_v2, %v1490_v6 }
 0x2ab   : > { %3448 = vmatmul.msk.f32.gmra.mxu1 %vm1232_vm2, %v4575_v55  ;;  %3460 = vmatmul.msk.f32.vlgmr.msrb.gmra.mxu2 %vm1232_vm2, %v4575_v55 }
 0x2ac   : > { %v1971_v59 = vpop.f32.mrf.mxu1  ;;  %v1492_v46 = vpop.f32.mrf.mxu3  ;;  %v2002_v24 = vadd.f32 %v1968_v52, %v1640_v27 }
 0x2ad   : > { %v1493_v51 = vadd.f32 %v1492_v46, %v4464_v21 }
 0x2af   : > { %v2318_v35 = vpop.f32.mrf.mxu2 }
 0x2b0   : > { %v4586_v50 = vadd.f32 %v2318_v35, %v1998_v54  ;;  %v1612_v54 = vpop.f32.mrf.mxu0  ;;  %v1448_v35 = vadd.f32 %v4420_v11, %v4334_v33  ;;  %v1451_v11 = vadd.f32 %v4440_v47, %v4344_v37 }
 0x2b2   : > { %3413 = vmatmul.msk.f32.gmra.mxu3 %vm1232_vm2, %v4586_v50  ;;  %3437 = vmatmul.msk.f32.gmra.mxu0 %vm1232_vm2, %v4586_v50  ;;  %v1627_v5 = vadd.f32 %v4459_v42, %v1448_v35  ;;  %v1628_v48 = vadd.f32 %v4467_v40, %v1451_v11 }
 0x2b3   : > { %3449 = vmatmul.msk.f32.gmra.mxu1 %vm1232_vm2, %v4586_v50  ;;  %3461 = vmatmul.msk.f32.gmra.mxu2 %vm1232_vm2, %v4586_v50 }
 0x2b4   : > { %v1989_v25 = vadd.f32 %v4462_v63, %v1627_v5  ;;  %v1495_v34 = vpop.f32.mrf.mxu3  ;;  %v1990_v63 = vadd.f32 %v4477_v57, %v1628_v48 }
 0x2b6   : > { %v2351_v42 = vadd.f32 %v4503_v36, %v1989_v25  ;;  %v1496_v36 = vadd.f32 %v1495_v34, %v4474_v30 }
 0x2b7   : > { %v2321_v49 = vpop.f32.mrf.mxu2 }
 0x2b8   : > { %v4597_v8 = vadd.f32 %v2321_v49, %v1999_v60  ;;  %v1974_v60 = vpop.f32.mrf.mxu1  ;;  %v2003_v49 = vadd.f32 %v1971_v59, %v1641_v62  ;;  %v1615_v15 = vpop.f32.mrf.mxu0 }
 0x2b9   : > { %v1643_v52 = vadd.f32 %v1615_v15, %v1496_v36 }
 0x2ba   : > { %3414 = vmatmul.msk.f32.gmra.mxu3 %vm1232_vm2, %v4597_v8  ;;  %3438 = vmatmul.msk.f32.gmra.mxu0 %vm1232_vm2, %v4597_v8 }
 0x2bb   : > { %3450 = vmatmul.msk.f32.gmra.mxu1 %vm1232_vm2, %v4597_v8  ;;  %3462 = vmatmul.msk.f32.gmra.mxu2 %vm1232_vm2, %v4597_v8 }
 0x2bc   : > { %v1498_v40 = vpop.f32.mrf.mxu3 }
 0x2bd   : > { %v1499_v2 = vadd.f32 %v1498_v40, %v4480_v16  ;;  %v4702_v40 = vld [vmem:[%s4940_s4] ss:$0 sm:$0xff] }
 0x2bf   : > { %v2324_v18 = vpop.f32.mrf.mxu2 }
 0x2c0   : > { %v4608_v7 = vadd.f32 %v2324_v18, %v2000_v9  ;;  %v1642_v9 = vadd.f32 %v1612_v54, %v1493_v51  ;;  %v1977_v47 = vpop.f32.mrf.mxu1  ;;  %v2352_v18 = vadd.f32 %v4510_v32, %v1990_v63  ;;  %v1618_v20 = vpop.f32.mrf.mxu0 }
 0x2c1   : > { %v2005_v57 = vadd.f32 %v1977_v47, %v1643_v52 }
 0x2c2   : > { %3415 = vmatmul.msk.f32.gmra.mxu3 %vm1232_vm2, %v4608_v7  ;;  %3439 = vmatmul.msk.f32.gmra.mxu0 %vm1232_vm2, %v4608_v7  ;;  %v2004_v37 = vadd.f32 %v1974_v60, %v1642_v9 }
 0x2c3   : > { %3451 = vmatmul.msk.f32.gmra.mxu1 %vm1232_vm2, %v4608_v7  ;;  %3463 = vmatmul.msk.f32.gmra.mxu2 %vm1232_vm2, %v4608_v7 }
 0x2c4   : > { %v1501_v32 = vpop.f32.mrf.mxu3 }
 0x2c5   : > { %v1502_v59 = vadd.f32 %v1501_v32, %v4488_v12 }
 0x2c7   : > { %v2327_v10 = vpop.f32.mrf.mxu2 }
 0x2c8   : > { %v2363_v23 = vadd.f32 %v2327_v10, %v2001_v19  ;;  %v1980_v30 = vpop.f32.mrf.mxu1  ;;  %v1644_v10 = vadd.f32 %v1618_v20, %v1499_v2  ;;  %v1621_v58 = vpop.f32.mrf.mxu0 }
 0x2ca   : > { %3416 = vmatmul.msk.f32.gmra.mxu3 %vm1232_vm2, %v2363_v23  ;;  %3440 = vmatmul.msk.f32.gmra.mxu0 %vm1232_vm2, %v2363_v23 }
 0x2cb   : > { %3452 = vmatmul.msk.f32.gmra.mxu1 %vm1232_vm2, %v2363_v23  ;;  %3464 = vmatmul.msk.f32.gmra.mxu2 %vm1232_vm2, %v2363_v23  ;;  %v2006_v23 = vadd.f32 %v1980_v30, %v1644_v10 }
 0x2cf   : > { %v2330_v14 = vpop.f32.mrf.mxu2 }
 0x2d0   : > { %v2364_v31 = vadd.f32 %v2330_v14, %v2002_v24  ;;  %v1645_v24 = vadd.f32 %v1621_v58, %v1502_v59  ;;  %v1983_v16 = vpop.f32.mrf.mxu1  ;;  %v1624_v14 = vpop.f32.mrf.mxu0 }
 0x2d2   : > { %3417 = vmatmul.msk.f32.gmra.mxu3 %vm1232_vm2, %v2364_v31  ;;  %3441 = vmatmul.msk.f32.gmra.mxu0 %vm1232_vm2, %v2364_v31  ;;  %v2007_v54 = vadd.f32 %v1983_v16, %v1645_v24 }
 0x2d3   : > { %3453 = vmatmul.msk.f32.gmra.mxu1 %vm1232_vm2, %v2364_v31  ;;  %3465 = vmatmul.msk.f32.gmra.mxu2 %vm1232_vm2, %v2364_v31 }
 0x2d7   : > { %v2333_v33 = vpop.f32.mrf.mxu2 }
 0x2d8   : > { %v2365_v3 = vadd.f32 %v2333_v33, %v2003_v49  ;;  %v1986_v12 = vpop.f32.mrf.mxu1 }
 0x2da   : > { %3418 = vmatmul.msk.f32.vlgmr.msra.gmra.mxu3 %vm1232_vm2, %v2351_v42  ;;  %3442 = vmatmul.msk.f32.gmra.mxu0 %vm1232_vm2, %v2365_v3 }
 0x2db   : > { %3454 = vmatmul.msk.f32.gmra.mxu1 %vm1232_vm2, %v2365_v3  ;;  %3466 = vmatmul.msk.f32.gmra.mxu2 %vm1232_vm2, %v2365_v3 }
 0x2df   : > { %v2336_v21 = vpop.f32.mrf.mxu2 }
 0x2e0   : > { %v2366_v13 = vadd.f32 %v2336_v21, %v2004_v37 }
 0x2e2   : > { %3419 = vmatmul.msk.f32.gmra.mxu3 %vm1232_vm2, %v2352_v18  ;;  %3443 = vmatmul.msk.f32.gmra.mxu0 %vm1232_vm2, %v2366_v13 }
 0x2e3   : > { %3455 = vmatmul.msk.f32.gmra.mxu1 %vm1232_vm2, %v2366_v13  ;;  %3467 = vmatmul.msk.f32.gmra.mxu2 %vm1232_vm2, %v2366_v13 }
 0x2e7   : > { %v2339_v17 = vpop.f32.mrf.mxu2 }
 0x2e8   : > { %v2367_v19 = vadd.f32 %v2339_v17, %v2005_v57 }
 0x2ea   : > { %3420 = vmatmul.msk.f32.gmra.mxu3 %vm1232_vm2, %v4526_v45  ;;  %v1504_v45 = vpop.f32.mrf.mxu3 }
 0x2eb   : > { %3456 = vmatmul.msk.f32.gmra.mxu1 %vm1232_vm2, %v2367_v19  ;;  %3468 = vmatmul.msk.f32.gmra.mxu2 %vm1232_vm2, %v2367_v19  ;;  %v1505_v6 = vadd.f32 %v1504_v45, %v4495_v28  ;;  %v3027_v28 = vld [vmem:[%s4941_s5 + $0x8] sm:$0xff] }
 0x2ec   : > { %3082 = vmatpush.msrb.mxu3 %v3027_v28 }
 0x2ed   : > { %v1646_v5 = vadd.f32 %v1624_v14, %v1505_v6 }
 0x2ef   : > { %v2342_v27 = vpop.f32.mrf.mxu2  ;;  %v2008_v62 = vadd.f32 %v1986_v12, %v1646_v5 }
 0x2f0   : > { %v2368_v46 = vadd.f32 %v2342_v27, %v2006_v23 }
 0x2f2   : > { %3421 = vmatmul.msk.f32.gmra.mxu3 %vm1232_vm2, %v4535_v39 }
 0x2f3   : > { %3457 = vmatmul.msk.f32.gmra.mxu1 %vm1232_vm2, %v2368_v46  ;;  %3469 = vmatmul.msk.f32.gmra.mxu2 %vm1232_vm2, %v2368_v46 }
 0x2f7   : > { %v2345_v35 = vpop.f32.mrf.mxu2 }
 0x2f8   : > { %v2369_v31 = vadd.f32 %v2345_v35, %v2007_v54 }
 0x2fa   : > { %3422 = vmatmul.msk.f32.gmra.mxu3 %vm1232_vm2, %v4540_v26 }
 0x2fb   : > { %3470 = vmatmul.msk.f32.gmra.mxu2 %vm1232_vm2, %v2369_v31 }
 0x2fd   : > { %v2429_v39 = vpop.f32.mrf.mxu3 }
 0x2ff   : > { %v2348_v60 = vpop.f32.mrf.mxu2 }
 0x300   : > { %v2370_v25 = vadd.f32 %v2348_v60, %v2008_v62 }
 0x302   : > { %3423 = vmatmul.msk.f32.gmra.mxu3 %vm1232_vm2, %v4550_v43 }
 0x303   : > { %3471 = vmatmul.msk.f32.gmra.mxu2 %vm1232_vm2, %v2370_v25 }
 0x305   : > { %v2432_v49 = vpop.f32.mrf.mxu3 }
 0x307   : > { %v2550_v51 = vpop.f32.mrf.mxu0 }
 0x30a   : > { %3424 = vmatmul.msk.f32.gmra.mxu3 %vm1232_vm2, %v4557_v22 }
 0x30d   : > { %v2435_v26 = vpop.f32.mrf.mxu3 }
 0x30f   : > { %v2553_v15 = vpop.f32.mrf.mxu0 }
 0x312   : > { %3425 = vmatmul.msk.f32.gmra.mxu3 %vm1232_vm2, %v4566_v38 }
 0x315   : > { %v2438_v34 = vpop.f32.mrf.mxu3 }
 0x317   : > { %v2556_v63 = vpop.f32.mrf.mxu0 }
 0x318   : > { %v2624_v42 = vpop.f32.mrf.mxu1 }
 0x31a   : > { %3426 = vmatmul.msk.f32.gmra.mxu3 %vm1232_vm2, %v4575_v55  ;;  %v3026_v55 = vld [vmem:[%s4941_s5] sm:$0xff] }
 0x31b   : > { %3083 = vmatpush.msrb.mxu3 %v3026_v55 }
 0x31d   : > { %v4674_v43 = vpop.f32.mrf.mxu3 }
 0x31f   : > { %v2559_v2 = vpop.f32.mrf.mxu0 }
 0x320   : > { %v2627_v48 = vpop.f32.mrf.mxu1 }
 0x322   : > { %3427 = vmatmul.msk.f32.gmra.mxu3 %vm1232_vm2, %v4586_v50 }
 0x325   : > { %v4678_v33 = vpop.f32.mrf.mxu3 }
 0x327   : > { %v2562_v54 = vpop.f32.mrf.mxu0 }
 0x328   : > { %v2630_v21 = vpop.f32.mrf.mxu1 }
 0x32a   : > { %3428 = vmatmul.msk.f32.gmra.mxu3 %vm1232_vm2, %v4597_v8 }
 0x32d   : > { %v4682_v22 = vpop.f32.mrf.mxu3 }
 0x32e   : > { %v2698_v3 = vpop.f32.mrf.mxu2 }
 0x330   : > { %v2633_v10 = vpop.f32.mrf.mxu1 }
 0x332   : > { %3429 = vmatmul.msk.f32.gmra.mxu3 %vm1232_vm2, %v4608_v7 }
 0x335   : > { %v4686_v38 = vpop.f32.mrf.mxu3 }
 0x336   : > { %v2701_v7 = vpop.f32.mrf.mxu2 }
 0x338   : > { %v2636_v31 = vpop.f32.mrf.mxu1 }
 0x33d   : > { %v4691_v11 = vpop.f32.mrf.mxu3 }
 0x33e   : > { %v2704_v18 = vpop.f32.mrf.mxu2 }
 0x345   : > { %v4693_v50 = vpop.f32.mrf.mxu3 }
 0x346   : > { %v2707_v23 = vpop.f32.mrf.mxu2 }
 0x34d   : > { %v4695_v8 = vpop.f32.mrf.mxu3 }
 0x355   : > { %v4697_v9 = vpop.f32.mrf.mxu3 }
 0x35d   : > { %v2488_v37 = vpop.f32.mrf.mxu3 }
 0x35e   : > { %v2489_v47 = vadd.f32 %v2488_v37, %v2429_v39  ;;  %v2710_v39 = vpop.f32.mrf.mxu2 }
 0x360   : > { %v2586_v36 = vadd.f32 %v2550_v51, %v2489_v47 }
 0x362   : > { %v2660_v13 = vadd.f32 %v2624_v42, %v2586_v36 }
 0x364   : > { %v2734_v52 = vadd.f32 %v2698_v3, %v2660_v13 }
 0x365   : > { %v2491_v20 = vpop.f32.mrf.mxu3 }
 0x366   : > { %v4705_v57 = vadd.f32 %v4702_v40, %v2734_v52  ;;  %v2492_v17 = vadd.f32 %v2491_v20, %v2432_v49 }
 0x368   : > { %v2762_v19 = vmin.f32 %v4705_v57, 20.0  ;;  %v2587_v30 = vadd.f32 %v2553_v15, %v2492_v17  ;;  %v2565_v15 = vpop.f32.mrf.mxu0 }
 0x36a   : > { %v2774_v32 = vmul.f32 1.442695, %v2762_v19  ;;  %v2661_v58 = vadd.f32 %v2627_v48, %v2587_v30 }
 0x36c   : > { %3571 = vpow2.f32 %v2774_v32  ;;  %v2735_v27 = vadd.f32 %v2701_v7, %v2661_v58 }
 0x36d   : > { %v2494_v59 = vpop.f32.mrf.mxu3 }
 0x36e   : > { %v4709_v46 = vadd.f32 %v4702_v40, %v2735_v27  ;;  %v2495_v24 = vadd.f32 %v2494_v59, %v2435_v26 }
 0x370   : > { %v2763_v16 = vmin.f32 %v4709_v46, 20.0  ;;  %v2588_v45 = vadd.f32 %v2556_v63, %v2495_v24  ;;  %v2639_v63 = vpop.f32.mrf.mxu1  ;;  %v2568_v59 = vpop.f32.mrf.mxu0 }
 0x372   : > { %v3572_v14 = vpop.eup %3571  ;;  %v2776_v35 = vmul.f32 1.442695, %v2763_v16  ;;  %v2662_v6 = vadd.f32 %v2630_v21, %v2588_v45 }
 0x373   : > { %v2798_v5 = vadd.f32 2.0, %v3572_v14 }
 0x374   : > { %3573 = vpow2.f32 %v2776_v35  ;;  %v2736_v12 = vadd.f32 %v2704_v18, %v2662_v6  ;;  %v2713_v18 = vpop.f32.mrf.mxu2 }
 0x375   : > { %v2810_v62 = vmul.f32 %v3572_v14, %v2798_v5  ;;  %v2497_v60 = vpop.f32.mrf.mxu3 }
 0x376   : > { %v4713_v25 = vadd.f32 %v4702_v40, %v2736_v12  ;;  %v2498_v49 = vadd.f32 %v2497_v60, %v2438_v34 }
 0x377   : > { %v2834_v28 = vadd.f32 2.0, %v2810_v62 }
 0x378   : > { %v2764_v26 = vmin.f32 %v4713_v25, 20.0  ;;  %v2589_v55 = vadd.f32 %v2559_v2, %v2498_v49  ;;  %v2642_v6 = vpop.f32.mrf.mxu1 }
 0x379   : > { %3575 = vrcp.f32 %v2834_v28  ;;  %v2855_v32 = vand.u32 2147483647, %v2834_v28  ;;  %v2857_v58 = vand.u32 2147483648, %v2834_v28  ;;  %vm2851_vm5 = vweird.f32 %v2834_v28 }
 0x37a   : > { %v3574_v51 = vpop.eup %3573  ;;  %v2778_v42 = vmul.f32 1.442695, %v2764_v26  ;;  %v2663_v3 = vadd.f32 %v2633_v10, %v2589_v55 }
 0x37b   : > { %v2799_v48 = vadd.f32 2.0, %v3574_v51  ;;  %vm2856_vm7 = vcmp.eq.f32.partialorder %v2855_v32, 8.507059e+37  ;;  %v2858_v5 = vor.u32 1.1754944e-38, %v2857_v58 }
 0x37c   : > { %3577 = vpow2.f32 %v2778_v42  ;;  %v2737_v7 = vadd.f32 %v2707_v23, %v2663_v3  ;;  %v2716_v55 = vpop.f32.mrf.mxu2 }
 0x37d   : > { %v2500_v37 = vpop.f32.mrf.mxu3  ;;  %v4716_v47 = vmul.f32 %v3574_v51, %v2799_v48 }
 0x37e   : > { %v4719_v21 = vadd.f32 %v4702_v40, %v2737_v7  ;;  %v2501_v34 = vadd.f32 %v2500_v37, %v4674_v43 }
 0x37f   : > { %v3576_v36 = vpop.eup %3575  ;;  %v2835_v13 = vadd.f32 2.0, %v4716_v47 }
 0x380   : > { %v2847_v52 = vmul.f32 %v3576_v36, %v2834_v28  ;;  %v2765_v20 = vmin.f32 %v4719_v21, 20.0  ;;  %v2590_v17 = vadd.f32 %v2562_v54, %v2501_v34  ;;  %vm2852_vm1 = vweird.f32 %v3576_v36 }
 0x381   : > { %3579 = vrcp.f32 %v2835_v13  ;;  %vm2853_vm6 = vmor %vm2851_vm5, %vm2852_vm1  ;;  %v2872_v48 = vand.u32 2147483648, %v2835_v13  ;;  %vm2866_vm9 = vweird.f32 %v2835_v13 }
 0x382   : > { %v3578_v2 = vpop.eup %3577  ;;  %v2848_v19 = vsub.f32 1.0, %v2847_v52  ;;  %v2780_v30 = vmul.f32 1.442695, %v2765_v20  ;;  %v2664_v10 = vadd.f32 %v2636_v31, %v2590_v17  ;;  %v2822_v31 = vmul.f32 %v2810_v62, %v4705_v57 }
 0x383   : > { %v2800_v23 = vadd.f32 2.0, %v3578_v2  ;;  %v2870_v62 = vand.u32 2147483647, %v2835_v13 }
 0x384   : > { %v2849_v27 = vmul.f32 %v3576_v36, %v2848_v19  ;;  %3581 = vpow2.f32 %v2780_v30  ;;  %v2738_v43 = vadd.f32 %v2710_v39, %v2664_v10  ;;  %v2823_v19 = vmul.f32 %v4716_v47, %v4709_v46 }
 0x385   : > { %v2503_v24 = vpop.f32.mrf.mxu3  ;;  %v4724_v16 = vmul.f32 %v3578_v2, %v2800_v23  ;;  %v2571_v2 = vpop.f32.mrf.mxu0  ;;  %vm2871_vm11 = vcmp.eq.f32.partialorder %v2870_v62, 8.507059e+37 }
 0x386   : > { %v2850_v45 = vadd.f32 %v3576_v36, %v2849_v27  ;;  %v4727_v54 = vadd.f32 %v4702_v40, %v2738_v43  ;;  %v2504_v14 = vadd.f32 %v2503_v24, %v4678_v33 }
 0x387   : > { %v3580_v35 = vpop.eup %3579  ;;  %v4732_v12 = vadd.f32 2.0, %v4724_v16 }
 0x388   : > { %v2854_v39 = vsel %vm2853_vm6, %v3576_v36, %v2850_v45  ;;  %v2766_v60 = vmin.f32 %v4727_v54, 20.0  ;;  %v2591_v49 = vadd.f32 %v2565_v15, %v2504_v14  ;;  %v2862_v28 = vmul.f32 %v3580_v35, %v2835_v13  ;;  %v2719_v45 = vpop.f32.mrf.mxu2 }
 0x389   : > { %v2859_v26 = vsel %vm2856_vm7, %v2858_v5, %v2854_v39  ;;  %3583 = vrcp.f32 %v4732_v12  ;;  %vm2867_vm8 = vweird.f32 %v3580_v35  ;;  %v2885_v14 = vand.u32 2147483647, %v4732_v12 }
 0x38a   : > { %v3582_v33 = vpop.eup %3581  ;;  %v2860_v51 = vmul.f32 %v2859_v26, %v2822_v31  ;;  %v2782_v42 = vmul.f32 1.442695, %v2766_v60  ;;  %v2665_v3 = vadd.f32 %v2639_v63, %v2591_v49  ;;  %v2863_v57 = vsub.f32 1.0, %v2862_v28  ;;  %vm2868_vm10 = vmor %vm2866_vm9, %vm2867_vm8 }
 0x38b   : > { %v2801_v7 = vadd.f32 2.0, %v3582_v33  ;;  %v2887_v31 = vand.u32 2147483648, %v4732_v12  ;;  %vm2881_vm13 = vweird.f32 %v4732_v12  ;;  %vm2886_vm14 = vcmp.eq.f32.partialorder %v2885_v14, 8.507059e+37 }
 0x38c   : > { %3585 = vpow2.f32 %v2782_v42  ;;  %v2739_v37 = vadd.f32 %v2713_v18, %v2665_v3  ;;  %3472 = vmatmul.msk.f32.vlgmr.msrb.gmra.mxu3 %vm1232_vm2, %v2860_v51  ;;  %v2864_v34 = vmul.f32 %v3580_v35, %v2863_v57  ;;  %v2873_v18 = vor.u32 1.1754944e-38, %v2872_v48 }
 0x38d   : > { %v2506_v15 = vpop.f32.mrf.mxu3  ;;  %v4737_v36 = vmul.f32 %v3582_v33, %v2801_v7  ;;  %v2824_v33 = vmul.f32 %v4724_v16, %v4713_v25 }
 0x38e   : > { %v4740_v52 = vadd.f32 %v4702_v40, %v2739_v37  ;;  %v2507_v20 = vadd.f32 %v2506_v15, %v4682_v22  ;;  %v2865_v17 = vadd.f32 %v3580_v35, %v2864_v34  ;;  %v2645_v22 = vpop.f32.mrf.mxu1 }
 0x38f   : > { %v3584_v63 = vpop.eup %3583  ;;  %v4746_v30 = vadd.f32 2.0, %v4737_v36 }
 0x390   : > { %v2767_v10 = vmin.f32 %v4740_v52, 20.0  ;;  %v2592_v32 = vadd.f32 %v2568_v59, %v2507_v20  ;;  %v2869_v58 = vsel %vm2868_vm10, %v3580_v35, %v2865_v17  ;;  %v2877_v23 = vmul.f32 %v3584_v63, %v4732_v12 }
 0x391   : > { %v2874_v27 = vsel %vm2871_vm11, %v2873_v18, %v2869_v58  ;;  %3587 = vrcp.f32 %v4746_v30  ;;  %vm2882_vm12 = vweird.f32 %v3584_v63  ;;  %v2900_v15 = vand.u32 2147483647, %v4746_v30 }
 0x392   : > { %v3586_v13 = vpop.eup %3585  ;;  %v2784_v43 = vmul.f32 1.442695, %v2767_v10  ;;  %v2666_v24 = vadd.f32 %v2642_v6, %v2592_v32  ;;  %v2875_v46 = vmul.f32 %v2874_v27, %v2823_v19  ;;  %v2878_v47 = vsub.f32 1.0, %v2877_v23  ;;  %vm2883_vm3 = vmor %vm2881_vm13, %vm2882_vm12  ;;  %v2722_v19 = vpop.f32.mrf.mxu2 }
 0x393   : > { %v2802_v5 = vadd.f32 2.0, %v3586_v13  ;;  %v2902_v20 = vand.u32 2147483648, %v4746_v30  ;;  %vm2896_vm15 = vweird.f32 %v4746_v30  ;;  %v2825_v27 = vmul.f32 %v4737_v36, %v4719_v21 }
 0x394   : > { %3589 = vpow2.f32 %v2784_v43  ;;  %v2740_v59 = vadd.f32 %v2716_v55, %v2666_v24  ;;  %3473 = vmatmul.msk.f32.gmra.mxu3 %vm1232_vm2, %v2875_v46  ;;  %v2879_v35 = vmul.f32 %v3584_v63, %v2878_v47  ;;  %v2888_v55 = vor.u32 1.1754944e-38, %v2887_v31 }
 0x395   : > { %v2509_v39 = vpop.f32.mrf.mxu3  ;;  %v4754_v60 = vmul.f32 %v3586_v13, %v2802_v5  ;;  %vm2901_vm1 = vcmp.eq.f32.partialorder %v2900_v15, 8.507059e+37  ;;  %v2903_v13 = vor.u32 1.1754944e-38, %v2902_v20 }
 0x396   : > { %v4757_v49 = vadd.f32 %v4702_v40, %v2740_v59  ;;  %v2510_v6 = vadd.f32 %v2509_v39, %v4686_v38  ;;  %v2880_v28 = vadd.f32 %v3584_v63, %v2879_v35  ;;  %v2574_v38 = vpop.f32.mrf.mxu0  ;;  %v2648_v34 = vpop.f32.mrf.mxu1 }
 0x397   : > { %v3588_v26 = vpop.eup %3587  ;;  %v4764_v51 = vadd.f32 2.0, %v4754_v60 }
 0x398   : > { %v2768_v42 = vmin.f32 %v4757_v49, 20.0  ;;  %v2593_v3 = vadd.f32 %v2571_v2, %v2510_v6  ;;  %v2884_v57 = vsel %vm2883_vm3, %v3584_v63, %v2880_v28  ;;  %v2892_v62 = vmul.f32 %v3588_v26, %v4746_v30 }
 0x399   : > { %v2889_v48 = vsel %vm2886_vm14, %v2888_v55, %v2884_v57  ;;  %3591 = vrcp.f32 %v4764_v51  ;;  %vm2897_vm4 = vweird.f32 %v3588_v26  ;;  %v2915_v59 = vand.u32 2147483647, %v4764_v51 }
 0x39a   : > { %v3590_v12 = vpop.eup %3589  ;;  %v2786_v7 = vmul.f32 1.442695, %v2768_v42  ;;  %v2667_v37 = vadd.f32 %v2645_v22, %v2593_v3  ;;  %v2890_v25 = vmul.f32 %v2889_v48, %v2824_v33  ;;  %v2893_v16 = vsub.f32 1.0, %v2892_v62  ;;  %vm2898_vm0 = vmor %vm2896_vm15, %vm2897_vm4 }
 0x39b   : > { %v2803_v17 = vadd.f32 2.0, %v3590_v12  ;;  %v2917_v35 = vand.u32 2147483648, %v4764_v51  ;;  %vm2911_vm6 = vweird.f32 %v4764_v51  ;;  %v2826_v48 = vmul.f32 %v4754_v60, %v4727_v54 }
 0x39c   : > { %3593 = vpow2.f32 %v2786_v7  ;;  %v2741_v2 = vadd.f32 %v2719_v45, %v2667_v37  ;;  %3474 = vmatmul.msk.f32.gmra.mxu3 %vm1232_vm2, %v2890_v25  ;;  %v2894_v63 = vmul.f32 %v3588_v26, %v2893_v16  ;;  %vm2916_vm8 = vcmp.eq.f32.partialorder %v2915_v59, 8.507059e+37 }
 0x39d   : > { %v2512_v18 = vpop.f32.mrf.mxu3  ;;  %v4772_v10 = vmul.f32 %v3590_v12, %v2803_v17  ;;  %v2918_v12 = vor.u32 1.1754944e-38, %v2917_v35 }
 0x39e   : > { %v4775_v32 = vadd.f32 %v4702_v40, %v2741_v2  ;;  %v2513_v58 = vadd.f32 %v2512_v18, %v4691_v11  ;;  %v2895_v23 = vadd.f32 %v3588_v26, %v2894_v63  ;;  %v2577_v36 = vpop.f32.mrf.mxu0 }
 0x39f   : > { %v3592_v22 = vpop.eup %3591  ;;  %v4782_v43 = vadd.f32 2.0, %v4772_v10 }
 0x3a0   : > { %v2769_v24 = vmin.f32 %v4775_v32, 20.0  ;;  %v2594_v46 = vadd.f32 %v2574_v38, %v2513_v58  ;;  %v2899_v47 = vsel %vm2898_vm0, %v3588_v26, %v2895_v23  ;;  %v2907_v45 = vmul.f32 %v3592_v22, %v4764_v51  ;;  %v2651_v26 = vpop.f32.mrf.mxu1  ;;  %v2725_v38 = vpop.f32.mrf.mxu2 }
 0x3a1   : > { %v2904_v11 = vsel %vm2901_vm1, %v2903_v13, %v2899_v47  ;;  %3595 = vrcp.f32 %v4782_v43  ;;  %vm2912_vm5 = vweird.f32 %v3592_v22  ;;  %v2930_v60 = vand.u32 2147483647, %v4782_v43 }
 0x3a2   : > { %v3594_v30 = vpop.eup %3593  ;;  %v2788_v14 = vmul.f32 1.442695, %v2769_v24  ;;  %v2668_v31 = vadd.f32 %v2648_v34, %v2594_v46  ;;  %v2905_v5 = vmul.f32 %v2904_v11, %v2825_v27  ;;  %v2908_v21 = vsub.f32 1.0, %v2907_v45  ;;  %vm2913_vm7 = vmor %vm2911_vm6, %vm2912_vm5 }
 0x3a3   : > { %v2804_v39 = vadd.f32 2.0, %v3594_v30  ;;  %v2932_v2 = vand.u32 2147483648, %v4782_v43  ;;  %vm2926_vm10 = vweird.f32 %v4782_v43  ;;  %v2827_v45 = vmul.f32 %v4772_v10, %v4740_v52 }
 0x3a4   : > { %3597 = vpow2.f32 %v2788_v14  ;;  %v2742_v6 = vadd.f32 %v2722_v19, %v2668_v31  ;;  %3475 = vmatmul.msk.f32.gmra.mxu3 %vm1232_vm2, %v2905_v5  ;;  %v2909_v28 = vmul.f32 %v3592_v22, %v2908_v21  ;;  %vm2931_vm12 = vcmp.eq.f32.partialorder %v2930_v60, 8.507059e+37 }
 0x3a5   : > { %v2515_v33 = vpop.f32.mrf.mxu3  ;;  %v4790_v55 = vmul.f32 %v3594_v30, %v2804_v39  ;;  %v2933_v11 = vor.u32 1.1754944e-38, %v2932_v2 }
 0x3a6   : > { %v4793_v42 = vadd.f32 %v4702_v40, %v2742_v6  ;;  %v2516_v3 = vadd.f32 %v2515_v33, %v4693_v50  ;;  %v2910_v57 = vadd.f32 %v3592_v22, %v2909_v28  ;;  %v2580_v58 = vpop.f32.mrf.mxu0 }
 0x3a7   : > { %v3596_v62 = vpop.eup %3595  ;;  %v4800_v7 = vadd.f32 2.0, %v4790_v55 }
 0x3a8   : > { %v2770_v37 = vmin.f32 %v4793_v42, 20.0  ;;  %v2595_v25 = vadd.f32 %v2577_v36, %v2516_v3  ;;  %v2914_v16 = vsel %vm2913_vm7, %v3592_v22, %v2910_v57  ;;  %v2922_v50 = vmul.f32 %v3596_v62, %v4782_v43  ;;  %v2654_v47 = vpop.f32.mrf.mxu1  ;;  %v2728_v21 = vpop.f32.mrf.mxu2 }
 0x3a9   : > { %v2919_v34 = vsel %vm2916_vm8, %v2918_v12, %v2914_v16  ;;  %3599 = vrcp.f32 %v4800_v7  ;;  %vm2927_vm9 = vweird.f32 %v3596_v62  ;;  %v2945_v39 = vand.u32 2147483647, %v4800_v7 }
 0x3aa   : > { %v3598_v51 = vpop.eup %3597  ;;  %v2790_v15 = vmul.f32 1.442695, %v2770_v37  ;;  %v2669_v20 = vadd.f32 %v2651_v26, %v2595_v25  ;;  %v2920_v17 = vmul.f32 %v2919_v34, %v2826_v48  ;;  %v2923_v54 = vsub.f32 1.0, %v2922_v50  ;;  %vm2928_vm11 = vmor %vm2926_vm10, %vm2927_vm9 }
 0x3ab   : > { %v2805_v63 = vadd.f32 2.0, %v3598_v51  ;;  %v2947_v6 = vand.u32 2147483648, %v4800_v7  ;;  %vm2941_vm3 = vweird.f32 %v4800_v7  ;;  %v2828_v25 = vmul.f32 %v4790_v55, %v4757_v49 }
 0x3ac   : > { %3601 = vpow2.f32 %v2790_v15  ;;  %v2743_v19 = vadd.f32 %v2725_v38, %v2669_v20  ;;  %3476 = vmatmul.msk.f32.gmra.mxu3 %vm1232_vm2, %v2920_v17  ;;  %v2924_v18 = vmul.f32 %v3596_v62, %v2923_v54  ;;  %vm2946_vm4 = vcmp.eq.f32.partialorder %v2945_v39, 8.507059e+37 }
 0x3ad   : > { %v2518_v23 = vpop.f32.mrf.mxu3  ;;  %v4808_v22 = vmul.f32 %v3598_v51, %v2805_v63  ;;  %v2948_v16 = vor.u32 1.1754944e-38, %v2947_v6 }
 0x3ae   : > { %v4811_v27 = vadd.f32 %v4702_v40, %v2743_v19  ;;  %v2519_v13 = vadd.f32 %v2518_v23, %v4695_v8  ;;  %v2925_v24 = vadd.f32 %v3596_v62, %v2924_v18  ;;  %v2583_v37 = vpop.f32.mrf.mxu0 }
 0x3af   : > { %v3600_v46 = vpop.eup %3599  ;;  %v4818_v30 = vadd.f32 2.0, %v4808_v22 }
 0x3b0   : > { %v2771_v14 = vmin.f32 %v4811_v27, 20.0  ;;  %v2596_v31 = vadd.f32 %v2580_v58, %v2519_v13  ;;  %v2929_v5 = vsel %vm2928_vm11, %v3596_v62, %v2925_v24  ;;  %v2937_v8 = vmul.f32 %v3600_v46, %v4800_v7  ;;  %v2731_v49 = vpop.f32.mrf.mxu2 }
 0x3b1   : > { %v2934_v36 = vsel %vm2931_vm12, %v2933_v11, %v2929_v5  ;;  %3603 = vrcp.f32 %v4818_v30  ;;  %vm2942_vm13 = vweird.f32 %v3600_v46  ;;  %v2960_v55 = vand.u32 2147483647, %v4818_v30 }
 0x3b2   : > { %v3602_v43 = vpop.eup %3601  ;;  %v2792_v59 = vmul.f32 1.442695, %v2771_v14  ;;  %v2670_v35 = vadd.f32 %v2654_v47, %v2596_v31  ;;  %v2935_v52 = vmul.f32 %v2934_v36, %v2827_v45  ;;  %v2938_v10 = vsub.f32 1.0, %v2937_v8  ;;  %vm2943_vm14 = vmor %vm2941_vm3, %vm2942_vm13 }
 0x3b3   : > { %v2806_v28 = vadd.f32 2.0, %v3602_v43  ;;  %v2962_v19 = vand.u32 2147483648, %v4818_v30  ;;  %vm2956_vm0 = vweird.f32 %v4818_v30  ;;  %v2829_v45 = vmul.f32 %v4808_v22, %v4775_v32 }
 0x3b4   : > { %3605 = vpow2.f32 %v2792_v59  ;;  %v2744_v26 = vadd.f32 %v2728_v21, %v2670_v35  ;;  %3477 = vmatmul.msk.f32.gmra.mxu3 %vm1232_vm2, %v2935_v52  ;;  %v2939_v33 = vmul.f32 %v3600_v46, %v2938_v10  ;;  %vm2961_vm5 = vcmp.eq.f32.partialorder %v2960_v55, 8.507059e+37 }
 0x3b5   : > { %v2521_v3 = vpop.f32.mrf.mxu3  ;;  %v4826_v57 = vmul.f32 %v3602_v43, %v2806_v28  ;;  %v2963_v11 = vor.u32 1.1754944e-38, %v2962_v19 }
 0x3b6   : > { %v4829_v62 = vadd.f32 %v4702_v40, %v2744_v26  ;;  %v2522_v38 = vadd.f32 %v2521_v3, %v4697_v9  ;;  %v2940_v48 = vadd.f32 %v3600_v46, %v2939_v33  ;;  %v2657_v9 = vpop.f32.mrf.mxu1 }
 0x3b7   : > { %v3604_v12 = vpop.eup %3603  ;;  %v2842_v50 = vadd.f32 2.0, %v4826_v57  ;;  %v2830_v26 = vmul.f32 %v4826_v57, %v4793_v42 }
 0x3b8   : > { %v2772_v34 = vmin.f32 %v4829_v62, 20.0  ;;  %v2597_v51 = vadd.f32 %v2583_v37, %v2522_v38  ;;  %v2944_v15 = vsel %vm2943_vm14, %v3600_v46, %v2940_v48  ;;  %v2952_v20 = vmul.f32 %v3604_v12, %v4818_v30 }
 0x3b9   : > { %v2949_v17 = vsel %vm2946_vm4, %v2948_v16, %v2944_v15  ;;  %3607 = vrcp.f32 %v2842_v50  ;;  %vm2957_vm15 = vweird.f32 %v3604_v12  ;;  %v2977_v35 = vand.u32 2147483648, %v2842_v50 }
 0x3ba   : > { %v3606_v7 = vpop.eup %3605  ;;  %v2794_v54 = vmul.f32 1.442695, %v2772_v34  ;;  %v2671_v60 = vadd.f32 %v2657_v9, %v2597_v51  ;;  %v2950_v2 = vmul.f32 %v2949_v17, %v2828_v25  ;;  %v2953_v63 = vsub.f32 1.0, %v2952_v20  ;;  %vm2958_vm1 = vmor %vm2956_vm0, %vm2957_vm15 }
 0x3bb   : > { %v2807_v18 = vadd.f32 2.0, %v3606_v7  ;;  %v2975_v22 = vand.u32 2147483647, %v2842_v50  ;;  %vm2971_vm7 = vweird.f32 %v2842_v50  ;;  %v2978_v6 = vor.u32 1.1754944e-38, %v2977_v35 }
 0x3bc   : > { %3609 = vpow2.f32 %v2794_v54  ;;  %v2745_v58 = vadd.f32 %v2731_v49, %v2671_v60  ;;  %3478 = vmatmul.msk.f32.gmra.mxu3 %vm1232_vm2, %v2950_v2  ;;  %v2954_v23 = vmul.f32 %v3604_v12, %v2953_v63 }
 0x3bd   : > { %v2819_v13 = vmul.f32 %v3606_v7, %v2807_v18  ;;  %vm2976_vm9 = vcmp.eq.f32.partialorder %v2975_v22, 8.507059e+37 }
 0x3be   : > { %v4842_v24 = vadd.f32 %v4702_v40, %v2745_v58  ;;  %v2955_v46 = vadd.f32 %v3604_v12, %v2954_v23 }
 0x3bf   : > { %v3608_v47 = vpop.eup %3607  ;;  %v2843_v14 = vadd.f32 2.0, %v2819_v13  ;;  %v2831_v9 = vmul.f32 %v2819_v13, %v4811_v27 }
 0x3c0   : > { %v2773_v31 = vmin.f32 %v4842_v24, 20.0  ;;  %v2959_v5 = vsel %vm2958_vm1, %v3604_v12, %v2955_v46  ;;  %v2967_v8 = vmul.f32 %v3608_v47, %v2842_v50  ;;  %vm2972_vm6 = vweird.f32 %v3608_v47 }
 0x3c1   : > { %v2964_v21 = vsel %vm2961_vm5, %v2963_v11, %v2959_v5  ;;  %3611 = vrcp.f32 %v2843_v14  ;;  %vm2973_vm8 = vmor %vm2971_vm7, %vm2972_vm6  ;;  %v2992_v25 = vand.u32 2147483648, %v2843_v14  ;;  %v2990_v34 = vand.u32 2147483647, %v2843_v14 }
 0x3c2   : > { %v3610_v36 = vpop.eup %3609  ;;  %v2796_v40 = vmul.f32 1.442695, %v2773_v31  ;;  %v2965_v43 = vmul.f32 %v2964_v21, %v2829_v45  ;;  %v2968_v59 = vsub.f32 1.0, %v2967_v8  ;;  %vm2986_vm11 = vweird.f32 %v2843_v14 }
 0x3c3   : > { %v2808_v30 = vadd.f32 2.0, %v3610_v36  ;;  %v2993_v42 = vor.u32 1.1754944e-38, %v2992_v25  ;;  %vm2991_vm13 = vcmp.eq.f32.partialorder %v2990_v34, 8.507059e+37 }
 0x3c4   : > { %3613 = vpow2.f32 %v2796_v40  ;;  %3479 = vmatmul.msk.f32.gmra.mxu3 %vm1232_vm2, %v2965_v43  ;;  %v2969_v32 = vmul.f32 %v3608_v47, %v2968_v59  ;;  %v3570_v43 = vld [vmem:[%s4942_s6] ss:$0 sm:$0xff] }
 0x3c5   : > { %v2820_v52 = vmul.f32 %v3610_v36, %v2808_v30 }
 0x3c6   : > { %v2970_v10 = vadd.f32 %v3608_v47, %v2969_v32 }
 0x3c7   : > { %v3612_v39 = vpop.eup %3611  ;;  %v2844_v28 = vadd.f32 2.0, %v2820_v52  ;;  %v2832_v27 = vmul.f32 %v2820_v52, %v4829_v62 }
 0x3c8   : > { %v2974_v33 = vsel %vm2973_vm8, %v3608_v47, %v2970_v10  ;;  %v2982_v3 = vmul.f32 %v3612_v39, %v2843_v14  ;;  %vm2987_vm10 = vweird.f32 %v3612_v39 }
 0x3c9   : > { %v2979_v38 = vsel %vm2976_vm9, %v2978_v6, %v2974_v33  ;;  %3615 = vrcp.f32 %v2844_v28  ;;  %vm2988_vm12 = vmor %vm2986_vm11, %vm2987_vm10  ;;  %v3007_v63 = vand.u32 2147483648, %v2844_v28  ;;  %v3005_v55 = vand.u32 2147483647, %v2844_v28 }
 0x3ca   : > { %v3614_v48 = vpop.eup %3613  ;;  %v2980_v12 = vmul.f32 %v2979_v38, %v2830_v26  ;;  %v2983_v37 = vsub.f32 1.0, %v2982_v3  ;;  %vm3001_vm14 = vweird.f32 %v2844_v28 }
 0x3cb   : > { %v2809_v16 = vadd.f32 2.0, %v3614_v48  ;;  %v3008_v58 = vor.u32 1.1754944e-38, %v3007_v63  ;;  %vm3006_vm15 = vcmp.eq.f32.partialorder %v3005_v55, 8.507059e+37 }
 0x3cc   : > { %3480 = vmatmul.msk.f32.gmra.mxu3 %vm1232_vm2, %v2980_v12  ;;  %v2984_v50 = vmul.f32 %v3612_v39, %v2983_v37 }
 0x3cd   : > { %v2821_v51 = vmul.f32 %v3614_v48, %v2809_v16 }
 0x3ce   : > { %v2985_v15 = vadd.f32 %v3612_v39, %v2984_v50 }
 0x3cf   : > { %v3616_v20 = vpop.eup %3615  ;;  %v2845_v57 = vadd.f32 2.0, %v2821_v51  ;;  %v2833_v62 = vmul.f32 %v2821_v51, %v4842_v24 }
 0x3d0   : > { %v2989_v17 = vsel %vm2988_vm12, %v3612_v39, %v2985_v15  ;;  %v2997_v7 = vmul.f32 %v3616_v20, %v2844_v28  ;;  %vm3002_vm3 = vweird.f32 %v3616_v20  ;;  %v4977_v15 = vld [vmem:[#allocation5_spill] sm:$0xff] }
 0x3d1   : > { %v2994_v54 = vsel %vm2991_vm13, %v2993_v42, %v2989_v17  ;;  %3617 = vrcp.f32 %v2845_v57  ;;  %vm3003_vm4 = vmor %vm3001_vm14, %vm3002_vm3  ;;  %v3022_v11 = vand.u32 2147483648, %v2845_v57  ;;  %v3020_v31 = vand.u32 2147483647, %v2845_v57  ;;  %v4978_v42 = vld [vmem:[#allocation6_spill] sm:$0xff]  ;;  %v4979_v17 = vld [vmem:[#allocation7_spill] sm:$0xff] }
 0x3d2   : > { %v2995_v60 = vmul.f32 %v2994_v54, %v2831_v9  ;;  %v2998_v2 = vsub.f32 1.0, %v2997_v7  ;;  %vm3016_vm1 = vweird.f32 %v2845_v57 }
 0x3d3   : > { %v3023_v8 = vor.u32 1.1754944e-38, %v3022_v11  ;;  %vm3021_vm6 = vcmp.eq.f32.partialorder %v3020_v31, 8.507059e+37 }
 0x3d4   : > { %3481 = vmatmul.msk.f32.gmra.mxu3 %vm1232_vm2, %v2995_v60  ;;  %v2999_v49 = vmul.f32 %v3616_v20, %v2998_v2 }
 0x3d6   : > { %v3000_v19 = vadd.f32 %v3616_v20, %v2999_v49 }
 0x3d7   : > { %v3618_v18 = vpop.eup %3617 }
 0x3d8   : > { %v3004_v23 = vsel %vm3003_vm4, %v3616_v20, %v3000_v19  ;;  %v3012_v13 = vmul.f32 %v3618_v18, %v2845_v57  ;;  %vm3017_vm0 = vweird.f32 %v3618_v18 }
 0x3d9   : > { %v3009_v46 = vsel %vm3006_vm15, %v3008_v58, %v3004_v23  ;;  %vm3018_vm5 = vmor %vm3016_vm1, %vm3017_vm0 }
 0x3da   : > { %v3010_v47 = vmul.f32 %v3009_v46, %v2832_v27  ;;  %v3013_v45 = vsub.f32 1.0, %v3012_v13 }
 0x3dc   : > { %3482 = vmatmul.msk.f32.gmra.mxu3 %vm1232_vm2, %v3010_v47  ;;  %v3014_v14 = vmul.f32 %v3618_v18, %v3013_v45 }
 0x3de   : > { %v3015_v5 = vadd.f32 %v3618_v18, %v3014_v14 }
 0x3e0   : > { %v3019_v21 = vsel %vm3018_vm5, %v3618_v18, %v3015_v5 }
 0x3e1   : > { %v3024_v36 = vsel %vm3021_vm6, %v3023_v8, %v3019_v21 }
 0x3e2   : > { %v3025_v40 = vmul.f32 %v3024_v36, %v2833_v62 }
 0x3e4   : > { %3483 = vmatmul.msk.f32.gmra.mxu3 %vm1232_vm2, %v3025_v40 }
 0x40f   : > { %v3085_v59 = vpop.f32.mrf.mxu3 }
 0x410   : > { %v3086_v35 = vadd.f32 %v3570_v43, %v3085_v59 }
 0x412   : > { %v3121_v30 = vadd.f32 %v3086_v35, %v4139_v61 }
 0x414   : > { %3133 = vst [vmem:[%s4865_s21] sm:$0xff] %v3121_v30 }
 0x417   : > { %v3088_v24 = vpop.f32.mrf.mxu3 }
 0x418   : > { %v3089_v32 = vadd.f32 %v3570_v43, %v3088_v24 }
 0x41a   : > { %v3122_v22 = vadd.f32 %v3089_v32, %v4155_v4 }
 0x41c   : > { %3134 = vst [vmem:[%s4865_s21 + $0x8] sm:$0xff] %v3122_v22 }
 0x41f   : > { %v3091_v52 = vpop.f32.mrf.mxu3 }
 0x420   : > { %v3092_v10 = vadd.f32 %v3570_v43, %v3091_v52 }
 0x422   : > { %v3123_v39 = vadd.f32 %v3092_v10, %v4177_v1 }
 0x424   : > { %3135 = vst [vmem:[%s4865_s21 + $0x10] sm:$0xff] %v3123_v39 }
 0x427   : > { %v3094_v61 = vpop.f32.mrf.mxu3 }
 0x428   : > { %v3095_v6 = vadd.f32 %v3570_v43, %v3094_v61 }
 0x42a   : > { %v3124_v28 = vadd.f32 %v3095_v6, %v4198_v44 }
 0x42c   : > { %3136 = vst [vmem:[%s4865_s21 + $0x18] sm:$0xff] %v3124_v28 }
 0x42f   : > { %v3097_v26 = vpop.f32.mrf.mxu3 }
 0x430   : > { %v3098_v33 = vadd.f32 %v3570_v43, %v3097_v26 }
 0x432   : > { %v3125_v3 = vadd.f32 %v3098_v33, %v4215_v56 }
 0x434   : > { %3137 = vst [vmem:[%s4865_s21 + $0x20] sm:$0xff] %v3125_v3 }
 0x437   : > { %v3100_v4 = vpop.f32.mrf.mxu3 }
 0x438   : > { %v3101_v38 = vadd.f32 %v3570_v43, %v3100_v4 }
 0x43a   : > { %v3126_v48 = vadd.f32 %v3101_v38, %v4226_v29 }
 0x43c   : > { %3138 = vst [vmem:[%s4865_s21 + $0x28] sm:$0xff] %v3126_v48 }
 0x43f   : > { %v3103_v1 = vpop.f32.mrf.mxu3 }
 0x440   : > { %v3104_v12 = vadd.f32 %v3570_v43, %v3103_v1 }
 0x442   : > { %v3127_v44 = vadd.f32 %v3104_v12, %v4243_v53 }
 0x444   : > { %3139 = vst [vmem:[%s4865_s21 + $0x30] sm:$0xff] %v3127_v44 }
 0x447   : > { %v3106_v37 = vpop.f32.mrf.mxu3 }
 0x448   : > { %v3107_v25 = vadd.f32 %v3570_v43, %v3106_v37 }
 0x44a   : > { %v3128_v16 = vadd.f32 %v3107_v25, %v4250_v41 }
 0x44c   : > { %3140 = vst [vmem:[%s4865_s21 + $0x38] sm:$0xff] %v3128_v16 }
 0x44f   : > { %v3109_v56 = vpop.f32.mrf.mxu3 }
 0x450   : > { %v3110_v50 = vadd.f32 %v3570_v43, %v3109_v56 }
 0x452   : > { %v3129_v29 = vadd.f32 %v3110_v50, %v4260_v0 }
 0x454   : > { %3141 = vst [vmem:[%s4865_s21 + $0x40] sm:$0xff] %v3129_v29 }
 0x457   : > { %v3112_v34 = vpop.f32.mrf.mxu3 }
 0x458   : > { %v3113_v51 = vadd.f32 %v3570_v43, %v3112_v34 }
 0x45a   : > { %v3130_v20 = vadd.f32 %v3113_v51, %v4977_v15 }
 0x45c   : > { %3142 = vst [vmem:[%s4865_s21 + $0x48] sm:$0xff] %v3130_v20 }
 0x45f   : > { %v3115_v53 = vpop.f32.mrf.mxu3 }
 0x460   : > { %v3116_v41 = vadd.f32 %v3570_v43, %v3115_v53 }
 0x462   : > { %v3131_v57 = vadd.f32 %v3116_v41, %v4978_v42 }
 0x464   : > { %3143 = vst [vmem:[%s4865_s21 + $0x50] sm:$0xff] %v3131_v57 }
 0x467   : > { %v3118_v0 = vpop.f32.mrf.mxu3 }
 0x468   : > { %v3119_v9 = vadd.f32 %v3570_v43, %v3118_v0 }
 0x46a   : > { %v3132_v7 = vadd.f32 %v3119_v9, %v4979_v17 }
 0x46c   : > { %3144 = vst [vmem:[%s4865_s21 + $0x58] sm:$0xff] %v3132_v7 }
 0x46d   : > { %3646 = shalt.err (!%p3643_p7)
}
 0x46e   : > { %s3715_s16 = smov 128   ;;  %s3716_s21 = smov 8  }
 0x46f   : > { %3496 = dma.vmem_to_hbm [thread:$0]  (%p3808_p3), %s3161_s20, 1536, %s3163_s27, %s3146_s28, %s3715_s16, %s3715_s16, %s3716_s21  }
 0x470 PF: > { %p3502_p9 = scmp.ge.s32.totalorder %s3713_s8, 2  ;;  %s3177_s9 = sand.u32 1, %s3685_s24  }
 0x471   : > { %s3178_s10 = scalar_lea.sflag [#allocation3], %s3177_s9 }
 0x472   : > { %p3499_p10 = pnand %p3502_p9, %p3817_p8 }
 0x474   : > { %p3500_p11 = pneg %p3499_p10 }
 0x476   : > { %3680 = dma.done.wait (%p3500_p11), %s3178_s10, 1536  }
 0x477   : > { %3682 = vsyncadd (%p3500_p11), %s3178_s10, 4294965760  ;;  %s20_s8 = sadd.s32 1, %s3713_s8   ;;  %s4980_s24 = smov %s3689_s25 }
 0x478   : > { %p17_p12 = scmp.ge.s32.totalorder %s20_s8, 8   ;;  %s4981_s25 = smov %s3693_s26 }
 0x479   : > { %s4982_s26 = smov %s3826_s19  ;;  %s4983_s27 = smov %s3705_s29 }
 0x47a   : > { %s4984_s28 = smov %s3709_s30  ;;  %s4985_s29 = smov %s4988_s11 }
 0x47b   : > { %s4986_s30 = smov %s4992_s12  ;;  %19 = sbr.rel (!%p17_p12) target bundleno = 5 (0x5), region = 91 }
 0x480   :  { %3184 = vsyncpa [#allocation3], 1 }
 0x481   :  { %3186 = vsyncpa [#allocation3 + $0x1], 1 }

</bundles_post_ra>
